<compile_context>
chip_gen: v7x
topology: tpu7x:2x2x1
jax: 0.10.0
libtpu: 0.0.40
codegen_flags: <defaults>
</compile_context>

<pallas_src>
import functools

import numpy as np

import jax
import jax.numpy as jnp
from jax.experimental import pallas as pl
from jax.experimental.pallas import tpu as pltpu

_NEG = -1e30  # stands in for -inf; exp() underflows to exactly 0.0 in f32


def _build_shift_window_masks(H, W, neg=_NEG):
    """Exact transcription of Shiftwindow_attention.shift_window's 16 masks.

    Returned lane dense as (n_masks, H*W): 0.0 inside each window, -1e30 outside.
    """
    masks = []
    for i in range(4):
        sh, sw = int(H * (i / 8)), int(W * (i / 8))
        rhi, chi = int(H / 2 + H * (i / 8)), int(W / 2 + W * (i / 8))
        rlo, clo = int(H / 2) + sh, int(W / 2) + sw
        rend, cend = int(H + H * (i / 8)), int(W + W * (i / 8))

        m1 = np.full((H, W), neg, np.float32)
        m1[sh:rhi, sw:chi] = 0.0

        m2 = np.full((H, W), neg, np.float32)
        m2[sh:rhi, clo:cend] = 0.0
        m2[sh:rhi, 0:sw] = 0.0

        m3 = np.full((H, W), neg, np.float32)
        m3[rlo:rend, sw:chi] = 0.0
        m3[0:sh, sw:chi] = 0.0

        m4 = np.full((H, W), neg, np.float32)
        m4[rlo:rend, clo:cend] = 0.0
        m4[0:sh, 0:sw] = 0.0
        m4[rlo:rend, 0:sw] = 0.0
        m4[0:sh, clo:cend] = 0.0

        masks += [m1, m2, m3, m4]
    return np.stack(masks, 0).reshape(len(masks), H * W)


def _swin_attention_kernel(mask_ref, w_ref, inp_ref, out_ref):
    """Fused: 1x1 conv -> 16 masked softmaxes (batched) -> out = inp * (1 + swin).

    mask_ref: (n_masks, HW) f32  -- 0 inside each window, -1e30 outside (lane dense)
    w_ref:    (C, 1)        f32  -- conv_satt weight (no bias), channels on sublanes
    inp_ref:  (Bt, C, HW)        -- Bt images, NCHW flattened (pixels lane dense)
    out_ref:  (Bt, C, HW)
    """
    Bt = inp_ref.shape[0]
    masks = mask_ref[...]                     # (n_masks, HW), loaded once per step
    w_col = w_ref[...]                        # (C, 1)

    for b in range(Bt):                       # static unroll; Bt is small
        inp = inp_ref[b]                      # (C, HW)

        # ---- 1x1 conv (C -> 1, no bias): one elementwise mul + ONE channel-axis
        #      reduction (sublane axis -> mostly VPU adds, XLU stays free). ----
        x_row = jnp.sum(inp * w_col, axis=0, keepdims=True)           # (1, HW)

        # ---- all 16 masked softmaxes over HW in one dense (n_masks, HW) pass ----
        z = x_row + masks                                              # (n_masks, HW)
        mx = jnp.max(z, axis=-1, keepdims=True)                        # (n_masks, 1) finite
        e = jnp.exp(z - mx)                                            # masked -> exactly 0.0
        s = jnp.sum(e, axis=-1, keepdims=True)                         # (n_masks, 1)
        r = pl.reciprocal(s, approx=True)                              # EUP slot
        r = r * (2.0 - s * r)                                          # 1 Newton step -> f32 exact
        swin = jnp.sum(e * r, axis=0, keepdims=True)                   # (1, HW)

        # ---- att_out = swin * input + input (broadcast over channels/sublanes) ----
        out_ref[b] = (inp * (1.0 + swin)).astype(out_ref.dtype)


def shiftwindow_attention_forward(x_nchw, w, *, images_per_step=2):
    """x_nchw: (B, C, H, W); w: conv_satt weight, shape (C,) or (1, C, 1, 1)."""
    B, C, H, W = x_nchw.shape
    HW = H * W

    masks = _build_shift_window_masks(H, W)             # compile-time constant
    n_masks = masks.shape[0]

    # Largest divisor of B not exceeding the requested images-per-step.
    Bt = max(1, min(int(images_per_step), B))
    while B % Bt:
        Bt -= 1

    x_flat = x_nchw.reshape(B, C, HW)                   # NCHW flattened: free view
    w_col = jnp.asarray(w, x_nchw.dtype).reshape(C, 1)

    # Explicit VMEM budget: double-buffered in + out blocks, plus headroom for the
    # masks / weight / in-kernel temporaries (matters on v7x's 64 MiB VMEM per core).
    block_bytes = Bt * C * HW * x_flat.dtype.itemsize
    vmem_limit = int(min(128 << 20, max(32 << 20, 4 * block_bytes + (16 << 20))))

    out = pl.pallas_call(
        _swin_attention_kernel,
        out_shape=jax.ShapeDtypeStruct((B, C, HW), x_nchw.dtype),
        grid_spec=pltpu.PrefetchScalarGridSpec(
            num_scalar_prefetch=0,
            grid=(B // Bt,),
            in_specs=[
                pl.BlockSpec((n_masks, HW), lambda i: (0, 0)),
                pl.BlockSpec((C, 1), lambda i: (0, 0)),
                pl.BlockSpec((Bt, C, HW), lambda i: (i, 0, 0)),
            ],
            out_specs=pl.BlockSpec((Bt, C, HW), lambda i: (i, 0, 0)),
        ),
        compiler_params=pltpu.CompilerParams(
            dimension_semantics=("parallel",),
            vmem_limit_bytes=vmem_limit),
    )(jnp.asarray(masks), w_col, x_flat)

    return out.reshape(B, C, H, W)


def _reference_forward(x_nchw, w):
    """Plain-JAX line-by-line transcription of the PyTorch forward (NCHW)."""
    B, C, H, W = x_nchw.shape
    x = jnp.einsum("bchw,c->bhw", x_nchw, w)[:, None, :, :]   # 1x1 conv, no bias

    def softmax_hw(z):
        return jax.nn.softmax(z.reshape(B, 1, H * W), axis=-1).reshape(B, 1, H, W)

    ninf = float("-inf")
    swin = jnp.zeros_like(x)
    for i in range(4):
        m1 = np.zeros((H, W), np.float32) + ninf
        m1[0 + int(H * (i / 8)):int(H / 2 + H * (i / 8)),
           0 + int(W * (i / 8)):int(W / 2 + W * (i / 8))] = 0
        m2 = np.zeros((H, W), np.float32) + ninf
        m2[0 + int(H * (i / 8)):int(H / 2 + H * (i / 8)),
           int(W / 2) + int(W * (i / 8)):int(W + W * (i / 8))] = 0
        m2[0 + int(H * (i / 8)):int(H / 2 + H * (i / 8)), 0:int(W * (i / 8))] = 0
        m3 = np.zeros((H, W), np.float32) + ninf
        m3[int(H / 2) + int(H * (i / 8)):int(H + H * (i / 8)),
           0 + int(W * (i / 8)):int(W / 2 + W * (i / 8))] = 0
        m3[0:int(H * (i / 8)),
           0 + int(W * (i / 8)):int(W / 2 + W * (i / 8))] = 0
        m4 = np.zeros((H, W), np.float32) + ninf
        m4[int(H / 2) + int(H * (i / 8)):int(H + H * (i / 8)),
           int(W / 2) + int(W * (i / 8)):int(W + W * (i / 8))] = 0
        m4[0:int(H * (i / 8)), 0:int(W * (i / 8))] = 0
        m4[int(H / 2) + int(H * (i / 8)):int(H + H * (i / 8)), 0:int(W * (i / 8))] = 0
        m4[0:int(H * (i / 8)),
           int(W / 2) + int(W * (i / 8)):int(W + W * (i / 8))] = 0
        for m in (m1, m2, m3, m4):
            swin = swin + softmax_hw(x + jnp.asarray(m)[None, None])
    return swin * x_nchw + x_nchw


if __name__ == "__main__":
    # conv_satt hardwires 512 input channels; keep the spatial dims small.
    B, C, H, W = 4, 512, 16, 16

    key = jax.random.PRNGKey(0)
    kx, kw = jax.random.split(key)
    x = jax.random.normal(kx, (B, C, H, W), jnp.float32)
    # conv_satt.weight is (1, 512, 1, 1) in PyTorch; use it as a (512,) vector.
    w = jax.random.normal(kw, (C,), jnp.float32) * 0.05

    fwd = jax.jit(functools.partial(shiftwindow_attention_forward, images_per_step=2))
    out = fwd(x, w)
    jax.block_until_ready(out)
    assert out.shape == (B, C, H, W), out.shape

    ref = _reference_forward(x, w)
    jax.block_until_ready(ref)

    max_err = float(jnp.max(jnp.abs(out - ref)))
    assert jnp.allclose(out, ref, atol=1e-3, rtol=1e-3), max_err

    print("KERNEL_OK")
</pallas_src>

<mosaic_0001>
module attributes {stable_mosaic.version = 11 : i64} {
  func.func @_swin_attention_kernel(%arg0: i32, %arg1: memref<16x256xf32, #tpu.memory_space<vmem>>, %arg2: memref<512x1xf32, #tpu.memory_space<vmem>>, %arg3: memref<2x512x256xf32, #tpu.memory_space<vmem>>, %arg4: memref<2x512x256xf32, #tpu.memory_space<vmem>>) attributes {dimension_semantics = [#tpu.dimension_semantics<parallel>], iteration_bounds = array<i64: 2>, scalar_prefetch = 0 : i64, scratch_operands = 0 : i64, tpu.core_type = #tpu.core_type<tc>, window_params = [{pipeline_mode = #tpu.pipeline_mode<synchronous>, transform_indices = @transform_0, window_bounds = array<i64: 16, 256>}, {pipeline_mode = #tpu.pipeline_mode<synchronous>, transform_indices = @transform_1, window_bounds = array<i64: 512, 1>}, {transform_indices = @transform_2, window_bounds = array<i64: 2, 512, 256>}, {transform_indices = @transform_3, window_bounds = array<i64: 2, 512, 256>}]} {
    %c0 = arith.constant 0 : index
    %c0_0 = arith.constant 0 : index
    %0 = vector.load %arg1[%c0, %c0_0] : memref<16x256xf32, #tpu.memory_space<vmem>>, vector<16x256xf32>
    %c0_1 = arith.constant 0 : index
    %c0_2 = arith.constant 0 : index
    %1 = vector.load %arg2[%c0_1, %c0_2] : memref<512x1xf32, #tpu.memory_space<vmem>>, vector<512x1xf32>
    %c0_3 = arith.constant 0 : index
    %c0_4 = arith.constant 0 : index
    %c0_5 = arith.constant 0 : index
    %2 = vector.load %arg3[%c0_3, %c0_4, %c0_5] : memref<2x512x256xf32, #tpu.memory_space<vmem>>, vector<1x512x256xf32>
    %3 = vector.shape_cast %2 : vector<1x512x256xf32> to vector<512x256xf32>
    %4 = vector.broadcast %1 : vector<512x1xf32> to vector<512x256xf32>
    %5 = arith.mulf %3, %4 : vector<512x256xf32>
    %cst = arith.constant dense<0.000000e+00> : vector<256xf32>
    %6 = vector.multi_reduction <add>, %5, %cst [0] : vector<512x256xf32> to vector<256xf32>
    %7 = vector.shape_cast %6 : vector<256xf32> to vector<1x256xf32>
    %8 = vector.broadcast %7 : vector<1x256xf32> to vector<16x256xf32>
    %9 = arith.addf %8, %0 : vector<16x256xf32>
    %cst_6 = arith.constant dense<0xFF800000> : vector<16xf32>
    %10 = vector.multi_reduction <maximumf>, %9, %cst_6 [1] : vector<16x256xf32> to vector<16xf32>
    %11 = vector.shape_cast %10 : vector<16xf32> to vector<16x1xf32>
    %12 = vector.broadcast %11 : vector<16x1xf32> to vector<16x256xf32>
    %13 = arith.subf %9, %12 : vector<16x256xf32>
    %14 = math.exp %13 : vector<16x256xf32>
    %cst_7 = arith.constant dense<0.000000e+00> : vector<16xf32>
    %15 = vector.multi_reduction <add>, %14, %cst_7 [1] : vector<16x256xf32> to vector<16xf32>
    %16 = vector.shape_cast %15 : vector<16xf32> to vector<16x1xf32>
    %17 = tpu.reciprocal %16 {approx = true} : vector<16x1xf32> -> vector<16x1xf32>
    %18 = arith.mulf %16, %17 : vector<16x1xf32>
    %cst_8 = arith.constant 2.000000e+00 : f32
    %19 = vector.broadcast %cst_8 : f32 to vector<16x1xf32>
    %20 = arith.subf %19, %18 : vector<16x1xf32>
    %21 = arith.mulf %17, %20 : vector<16x1xf32>
    %22 = vector.broadcast %21 : vector<16x1xf32> to vector<16x256xf32>
    %23 = arith.mulf %14, %22 : vector<16x256xf32>
    %cst_9 = arith.constant dense<0.000000e+00> : vector<256xf32>
    %24 = vector.multi_reduction <add>, %23, %cst_9 [0] : vector<16x256xf32> to vector<256xf32>
    %25 = vector.shape_cast %24 : vector<256xf32> to vector<1x256xf32>
    %cst_10 = arith.constant 1.000000e+00 : f32
    %26 = vector.broadcast %cst_10 : f32 to vector<1x256xf32>
    %27 = arith.addf %26, %25 : vector<1x256xf32>
    %28 = vector.broadcast %27 : vector<1x256xf32> to vector<512x256xf32>
    %29 = arith.mulf %3, %28 : vector<512x256xf32>
    %c0_11 = arith.constant 0 : index
    %c0_12 = arith.constant 0 : index
    %c0_13 = arith.constant 0 : index
    %30 = vector.load %arg4[%c0_11, %c0_12, %c0_13] : memref<2x512x256xf32, #tpu.memory_space<vmem>>, vector<1x512x256xf32>
    %31 = vector.shape_cast %30 : vector<1x512x256xf32> to vector<512x256xf32>
    %32 = vector.shape_cast %29 : vector<512x256xf32> to vector<1x512x256xf32>
    tpu.vector_store %arg4[%c0_11, %c0_12, %c0_13], %32 {strides = array<i32>} : memref<2x512x256xf32, #tpu.memory_space<vmem>>, vector<1x512x256xf32>,
    %c1 = arith.constant 1 : index
    %c0_14 = arith.constant 0 : index
    %c0_15 = arith.constant 0 : index
    %33 = vector.load %arg3[%c1, %c0_14, %c0_15] : memref<2x512x256xf32, #tpu.memory_space<vmem>>, vector<1x512x256xf32>
    %34 = vector.shape_cast %33 : vector<1x512x256xf32> to vector<512x256xf32>
    %35 = vector.broadcast %1 : vector<512x1xf32> to vector<512x256xf32>
    %36 = arith.mulf %34, %35 : vector<512x256xf32>
    %cst_16 = arith.constant dense<0.000000e+00> : vector<256xf32>
    %37 = vector.multi_reduction <add>, %36, %cst_16 [0] : vector<512x256xf32> to vector<256xf32>
    %38 = vector.shape_cast %37 : vector<256xf32> to vector<1x256xf32>
    %39 = vector.broadcast %38 : vector<1x256xf32> to vector<16x256xf32>
    %40 = arith.addf %39, %0 : vector<16x256xf32>
    %cst_17 = arith.constant dense<0xFF800000> : vector<16xf32>
    %41 = vector.multi_reduction <maximumf>, %40, %cst_17 [1] : vector<16x256xf32> to vector<16xf32>
    %42 = vector.shape_cast %41 : vector<16xf32> to vector<16x1xf32>
    %43 = vector.broadcast %42 : vector<16x1xf32> to vector<16x256xf32>
    %44 = arith.subf %40, %43 : vector<16x256xf32>
    %45 = math.exp %44 : vector<16x256xf32>
    %cst_18 = arith.constant dense<0.000000e+00> : vector<16xf32>
    %46 = vector.multi_reduction <add>, %45, %cst_18 [1] : vector<16x256xf32> to vector<16xf32>
    %47 = vector.shape_cast %46 : vector<16xf32> to vector<16x1xf32>
    %48 = tpu.reciprocal %47 {approx = true} : vector<16x1xf32> -> vector<16x1xf32>
    %49 = arith.mulf %47, %48 : vector<16x1xf32>
    %cst_19 = arith.constant 2.000000e+00 : f32
    %50 = vector.broadcast %cst_19 : f32 to vector<16x1xf32>
    %51 = arith.subf %50, %49 : vector<16x1xf32>
    %52 = arith.mulf %48, %51 : vector<16x1xf32>
    %53 = vector.broadcast %52 : vector<16x1xf32> to vector<16x256xf32>
    %54 = arith.mulf %45, %53 : vector<16x256xf32>
    %cst_20 = arith.constant dense<0.000000e+00> : vector<256xf32>
    %55 = vector.multi_reduction <add>, %54, %cst_20 [0] : vector<16x256xf32> to vector<256xf32>
    %56 = vector.shape_cast %55 : vector<256xf32> to vector<1x256xf32>
    %cst_21 = arith.constant 1.000000e+00 : f32
    %57 = vector.broadcast %cst_21 : f32 to vector<1x256xf32>
    %58 = arith.addf %57, %56 : vector<1x256xf32>
    %59 = vector.broadcast %58 : vector<1x256xf32> to vector<512x256xf32>
    %60 = arith.mulf %34, %59 : vector<512x256xf32>
    %c1_22 = arith.constant 1 : index
    %c0_23 = arith.constant 0 : index
    %c0_24 = arith.constant 0 : index
    %61 = vector.load %arg4[%c1_22, %c0_23, %c0_24] : memref<2x512x256xf32, #tpu.memory_space<vmem>>, vector<1x512x256xf32>
    %62 = vector.shape_cast %61 : vector<1x512x256xf32> to vector<512x256xf32>
    %63 = vector.shape_cast %60 : vector<512x256xf32> to vector<1x512x256xf32>
    tpu.vector_store %arg4[%c1_22, %c0_23, %c0_24], %63 {strides = array<i32>} : memref<2x512x256xf32, #tpu.memory_space<vmem>>, vector<1x512x256xf32>,
    return
  }
  func.func @transform_0(%arg0: i32) -> (i32, i32) {
    %c0_i32 = arith.constant 0 : i32
    %c0_i32_0 = arith.constant 0 : i32
    %c0_i32_1 = arith.constant 0 : i32
    return %c0_i32, %c0_i32_0 : i32, i32
  }
  func.func @transform_1(%arg0: i32) -> (i32, i32) {
    %c0_i32 = arith.constant 0 : i32
    %c0_i32_0 = arith.constant 0 : i32
    %c0_i32_1 = arith.constant 0 : i32
    return %c0_i32, %c0_i32_0 : i32, i32
  }
  func.func @transform_2(%arg0: i32) -> (i32, i32, i32) {
    %c0_i32 = arith.constant 0 : i32
    %c0_i32_0 = arith.constant 0 : i32
    %c0_i32_1 = arith.constant 0 : i32
    return %arg0, %c0_i32, %c0_i32_0 : i32, i32, i32
  }
  func.func @transform_3(%arg0: i32) -> (i32, i32, i32) {
    %c0_i32 = arith.constant 0 : i32
    %c0_i32_0 = arith.constant 0 : i32
    %c0_i32_1 = arith.constant 0 : i32
    return %arg0, %c0_i32, %c0_i32_0 : i32, i32, i32
  }
}

</mosaic_0001>

<bundles_post_ra>
// kernel: shiftwindow_attention_forward.1
= control target key start
LH: loop header
LB: loop body
LE: loop exit
PB: predicated region body
PF: predicated region fallthrough
CT: control target
= control target key end

     0   :  { %s2608_s12 = smov 0   ;;  %s3948_s0 = inlined_call_operand.vmem [shape: f32[16,256], index: 0, kind: input, shape index: {}]   ;;  %s3949_s1 = inlined_call_operand.vmem [shape: f32[512,1], index: 1, kind: input, shape index: {}]   ;;  %s3950_s2 = inlined_call_operand.vmem [shape: f32[4,512,256], index: 2, kind: input, shape index: {}]   ;;  %s3951_s3 = inlined_call_operand.vmem [shape: f32[4,512,256], index: 3, kind: output, shape index: {}]  }
   0x1 LB: > { %s2039_s13 = sadd.s32 4294967295, %s2585_s12   ;;  %p2043_p0 = scmp.ge.s32.totalorder %s2585_s12, 1  ;;  %s2585_s12 = sphi %s2608_s12, %s13_s12  }
   0x2   : > { %p139_p1 = scmp.lt.s32.totalorder %s2585_s12, 3 }
   0x4   : > { %p140_p2 = pnand %p2043_p0, %p139_p1 }
   0x5   : > { %v185_v0 = vld [vmem:[%s3949_s1 + $0x10] sm:$0xff] (!%p140_p2)  ;;  %v183_v1 = vld [vmem:[%s3949_s1] sm:$0xff] (!%p140_p2)  ;;  %v2587_v2 = vmov (!%p140_p2), 0   ;;  %v186_v3 = vld [vmem:[%s3949_s1 + $0x18] sm:$0xff] (!%p140_p2)  ;;  %s2044_s30 = sshll.u32 (!%p140_p2), %s2039_s13, 1 }
   0x6   : > { %143 = sbr.rel (%p140_p2) target bundleno = 753 (0x2f1), region = 32  ;;  %2320 = vset.pattern.permute.xlu1 (!%p140_p2), %v2587_v2  ;;  %2319 = vset.pattern.permute.xlu0 (!%p140_p2), %v2587_v2  ;;  %v184_v4 = vld [vmem:[%s3949_s1 + $0x8] sm:$0xff] (!%p140_p2)  ;;  %v187_v6 = vld [vmem:[%s3949_s1 + $0x20] sm:$0xff] (!%p140_p2)  ;;  %v190_v7 = vld [vmem:[%s3949_s1 + $0x38] sm:$0xff] (!%p140_p2)  ;;  %p166_p3 = scmp.lt.s32.totalorder (!%p140_p2), %s2044_s30, 3 }
   0x7   : > { %387 = vperm.xlu1 (!%p140_p2), %2320, %v185_v0   ;;  %377 = vperm.xlu0 (!%p140_p2), %2319, %v183_v1   ;;  %v188_v5 = vld [vmem:[%s3949_s1 + $0x28] sm:$0xff] (!%p140_p2)  ;;  %v189_v8 = vld [vmem:[%s3949_s1 + $0x30] sm:$0xff] (!%p140_p2)  ;;  %v191_v10 = vld [vmem:[%s3949_s1 + $0x40] sm:$0xff] (!%p140_p2) }
   0x8   : > { %v192_v9 = vld [vmem:[%s3949_s1 + $0x48] sm:$0xff] (!%p140_p2)  ;;  %v194_v11 = vld [vmem:[%s3949_s1 + $0x58] sm:$0xff] (!%p140_p2)  ;;  %v193_v12 = vld [vmem:[%s3949_s1 + $0x50] sm:$0xff] (!%p140_p2) }
   0x9   : > { %v196_v13 = vld [vmem:[%s3949_s1 + $0x68] sm:$0xff] (!%p140_p2)  ;;  %v195_v14 = vld [vmem:[%s3949_s1 + $0x60] sm:$0xff] (!%p140_p2)  ;;  %v198_v15 = vld [vmem:[%s3949_s1 + $0x78] sm:$0xff] (!%p140_p2) }
   0xa   : > { %v197_v16 = vld [vmem:[%s3949_s1 + $0x70] sm:$0xff] (!%p140_p2)  ;;  %v200_v17 = vld [vmem:[%s3949_s1 + $0x88] sm:$0xff] (!%p140_p2)  ;;  %v199_v18 = vld [vmem:[%s3949_s1 + $0x80] sm:$0xff] (!%p140_p2) }
   0xb   : > { %392 = vperm.xlu1 (!%p140_p2), %2320, %v186_v3   ;;  %382 = vperm.xlu0 (!%p140_p2), %2319, %v184_v4   ;;  %v202_v19 = vld [vmem:[%s3949_s1 + $0x98] sm:$0xff] (!%p140_p2)  ;;  %v201_v20 = vld [vmem:[%s3949_s1 + $0x90] sm:$0xff] (!%p140_p2)  ;;  %v204_v21 = vld [vmem:[%s3949_s1 + $0xa8] sm:$0xff] (!%p140_p2) }
   0xc   : > { %v203_v22 = vld [vmem:[%s3949_s1 + $0xa0] sm:$0xff] (!%p140_p2)  ;;  %v206_v23 = vld [vmem:[%s3949_s1 + $0xb8] sm:$0xff] (!%p140_p2)  ;;  %v205_v24 = vld [vmem:[%s3949_s1 + $0xb0] sm:$0xff] (!%p140_p2) }
   0xd   : > { %v208_v25 = vld [vmem:[%s3949_s1 + $0xc8] sm:$0xff]  ;;  %v207_v26 = vld [vmem:[%s3949_s1 + $0xc0] sm:$0xff]  ;;  %v210_v27 = vld [vmem:[%s3949_s1 + $0xd8] sm:$0xff]  ;;  %s3953_s30 = smov (!%p166_p3, %s2044_s30), 3 }
   0xe   : > { %v209_v28 = vld [vmem:[%s3949_s1 + $0xd0] sm:$0xff]  ;;  %v212_v29 = vld [vmem:[%s3949_s1 + $0xe8] sm:$0xff]  ;;  %v211_v30 = vld [vmem:[%s3949_s1 + $0xe0] sm:$0xff]  ;;  %s2308_s17 = sshll.u32 %s3953_s30, 10 }
   0xf   : > { %402 = vperm.xlu1 %2320, %v188_v5   ;;  %397 = vperm.xlu0 %2319, %v187_v6   ;;  %v214_v31 = vld [vmem:[%s3949_s1 + $0xf8] sm:$0xff]  ;;  %v213_v32 = vld [vmem:[%s3949_s1 + $0xf0] sm:$0xff]  ;;  %v216_v33 = vld [vmem:[%s3949_s1 + $0x108] sm:$0xff]  ;;  %s2818_s20 = scalar_lea.vmem %s3950_s2, %s2308_s17  ;;  %s3163_s5 = scalar_lea.vmem %s3951_s3, %s2308_s17 }
  0x10   : > { %v215_v34 = vld [vmem:[%s3949_s1 + $0x100] sm:$0xff]  ;;  %v218_v35 = vld [vmem:[%s3949_s1 + $0x118] sm:$0xff]  ;;  %v217_v36 = vld [vmem:[%s3949_s1 + $0x110] sm:$0xff] }
  0x11   : > { %v220_v37 = vld [vmem:[%s3949_s1 + $0x128] sm:$0xff]  ;;  %v219_v38 = vld [vmem:[%s3949_s1 + $0x120] sm:$0xff]  ;;  %v222_v39 = vld [vmem:[%s3949_s1 + $0x138] sm:$0xff] }
  0x12   : > { %v221_v40 = vld [vmem:[%s3949_s1 + $0x130] sm:$0xff]  ;;  %v224_v41 = vld [vmem:[%s3949_s1 + $0x148] sm:$0xff]  ;;  %v223_v42 = vld [vmem:[%s3949_s1 + $0x140] sm:$0xff] }
  0x13   : > { %412 = vperm.xlu1 %2320, %v190_v7   ;;  %407 = vperm.xlu0 %2319, %v189_v8   ;;  %v226_v43 = vld [vmem:[%s3949_s1 + $0x158] sm:$0xff]  ;;  %v225_v44 = vld [vmem:[%s3949_s1 + $0x150] sm:$0xff]  ;;  %v228_v45 = vld [vmem:[%s3949_s1 + $0x168] sm:$0xff] }
  0x14   : > { %v227_v46 = vld [vmem:[%s3949_s1 + $0x160] sm:$0xff]  ;;  %v230_v47 = vld [vmem:[%s3949_s1 + $0x178] sm:$0xff]  ;;  %v229_v48 = vld [vmem:[%s3949_s1 + $0x170] sm:$0xff] }
  0x15   : > { %v232_v49 = vld [vmem:[%s3949_s1 + $0x188] sm:$0xff]  ;;  %v231_v50 = vld [vmem:[%s3949_s1 + $0x180] sm:$0xff]  ;;  %v234_v51 = vld [vmem:[%s3949_s1 + $0x198] sm:$0xff] }
  0x16   : > { %v233_v52 = vld [vmem:[%s3949_s1 + $0x190] sm:$0xff]  ;;  %v236_v53 = vld [vmem:[%s3949_s1 + $0x1a8] sm:$0xff]  ;;  %v235_v54 = vld [vmem:[%s3949_s1 + $0x1a0] sm:$0xff] }
  0x17   : > { %422 = vperm.xlu1 %2320, %v192_v9   ;;  %417 = vperm.xlu0 %2319, %v191_v10   ;;  %v238_v55 = vld [vmem:[%s3949_s1 + $0x1b8] sm:$0xff]  ;;  %v237_v56 = vld [vmem:[%s3949_s1 + $0x1b0] sm:$0xff]  ;;  %v240_v57 = vld [vmem:[%s3949_s1 + $0x1c8] sm:$0xff] }
  0x18   : > { %v239_v58 = vld [vmem:[%s3949_s1 + $0x1c0] sm:$0xff]  ;;  %v242_v59 = vld [vmem:[%s3949_s1 + $0x1d8] sm:$0xff]  ;;  %v241_v60 = vld [vmem:[%s3949_s1 + $0x1d0] sm:$0xff] }
  0x19   : > { %v244_v61 = vld [vmem:[%s3949_s1 + $0x1e8] sm:$0xff]  ;;  %v243_v62 = vld [vmem:[%s3949_s1 + $0x1e0] sm:$0xff]  ;;  %v246_v63 = vld [vmem:[%s3949_s1 + $0x1f8] sm:$0xff] }
  0x1a   : > { %v245_v0 = vld [vmem:[%s3949_s1 + $0x1f0] sm:$0xff]  ;;  %v247_v3 = vld [vmem:[%s2818_s20] sm:$0xff]  ;;  %v248_v4 = vld [vmem:[%s2818_s20 + $0x8] sm:$0xff] }
  0x1b   : > { %432 = vperm.xlu1 %2320, %v194_v11   ;;  %427 = vperm.xlu0 %2319, %v193_v12   ;;  %v251_v5 = vld [vmem:[%s2818_s20 + $0x20] sm:$0xff]  ;;  %v2051_v7 = vld [vmem:[%s2818_s20 + $0x408] sm:$0xff]  ;;  %v249_v8 = vld [vmem:[%s2818_s20 + $0x10] sm:$0xff] }
  0x1c   : > { %v2050_v6 = vld [vmem:[%s2818_s20 + $0x400] sm:$0xff]  ;;  %v250_v9 = vld [vmem:[%s2818_s20 + $0x18] sm:$0xff]  ;;  %v2052_v10 = vld [vmem:[%s2818_s20 + $0x410] sm:$0xff] }
  0x1d   : > { %v2053_v11 = vld [vmem:[%s2818_s20 + $0x418] sm:$0xff]  ;;  %v252_v12 = vld [vmem:[%s2818_s20 + $0x28] sm:$0xff] }
  0x1f   : > { %442 = vperm.xlu1 %2320, %v196_v13   ;;  %437 = vperm.xlu0 %2319, %v195_v14   ;;  %v2054_v13 = vld [vmem:[%s2818_s20 + $0x420] sm:$0xff]  ;;  %v2055_v14 = vld [vmem:[%s2818_s20 + $0x428] sm:$0xff] }
  0x23   : > { %452 = vperm.xlu1 %2320, %v198_v15   ;;  %447 = vperm.xlu0 %2319, %v197_v16  }
  0x27   : > { %462 = vperm.xlu1 %2320, %v200_v17   ;;  %457 = vperm.xlu0 %2319, %v199_v18  }
  0x2b   : > { %472 = vperm.xlu1 %2320, %v202_v19   ;;  %467 = vperm.xlu0 %2319, %v201_v20  }
  0x2f   : > { %482 = vperm.xlu1 %2320, %v204_v21   ;;  %477 = vperm.xlu0 %2319, %v203_v22   ;;  %v253_v21 = vld [vmem:[%s2818_s20 + $0x30] sm:$0xff]  ;;  %v254_v22 = vld [vmem:[%s2818_s20 + $0x38] sm:$0xff] }
  0x33   : > { %492 = vperm.xlu1 %2320, %v206_v23   ;;  %487 = vperm.xlu0 %2319, %v205_v24   ;;  %v2056_v23 = vld [vmem:[%s2818_s20 + $0x430] sm:$0xff]  ;;  %v2057_v24 = vld [vmem:[%s2818_s20 + $0x438] sm:$0xff] }
  0x37   : > { %502 = vperm.xlu1 %2320, %v208_v25   ;;  %497 = vperm.xlu0 %2319, %v207_v26  }
  0x3b   : > { %512 = vperm.xlu1 %2320, %v210_v27   ;;  %507 = vperm.xlu0 %2319, %v209_v28  }
  0x3f   : > { %522 = vperm.xlu1 %2320, %v212_v29   ;;  %517 = vperm.xlu0 %2319, %v211_v30  }
  0x43   : > { %532 = vperm.xlu1 %2320, %v214_v31   ;;  %527 = vperm.xlu0 %2319, %v213_v32  }
  0x47   : > { %542 = vperm.xlu1 %2320, %v216_v33   ;;  %537 = vperm.xlu0 %2319, %v215_v34   ;;  %v255_v33 = vld [vmem:[%s2818_s20 + $0x40] sm:$0xff] }
  0x4b   : > { %552 = vperm.xlu1 %2320, %v218_v35   ;;  %547 = vperm.xlu0 %2319, %v217_v36  }
  0x4f   : > { %562 = vperm.xlu1 %2320, %v220_v37   ;;  %557 = vperm.xlu0 %2319, %v219_v38  }
  0x53   : > { %572 = vperm.xlu1 %2320, %v222_v39   ;;  %567 = vperm.xlu0 %2319, %v221_v40   ;;  %v256_v40 = vld [vmem:[%s2818_s20 + $0x48] sm:$0xff] }
  0x57   : > { %582 = vperm.xlu1 %2320, %v224_v41   ;;  %577 = vperm.xlu0 %2319, %v223_v42   ;;  %v2058_v41 = vld [vmem:[%s2818_s20 + $0x440] sm:$0xff]  ;;  %v2059_v42 = vld [vmem:[%s2818_s20 + $0x448] sm:$0xff] }
  0x5b   : > { %592 = vperm.xlu1 %2320, %v226_v43   ;;  %587 = vperm.xlu0 %2319, %v225_v44  }
  0x5f   : > { %602 = vperm.xlu1 %2320, %v228_v45   ;;  %597 = vperm.xlu0 %2319, %v227_v46  }
  0x63   : > { %612 = vperm.xlu1 %2320, %v230_v47   ;;  %607 = vperm.xlu0 %2319, %v229_v48   ;;  %v257_v47 = vld [vmem:[%s2818_s20 + $0x50] sm:$0xff] }
  0x67   : > { %622 = vperm.xlu1 %2320, %v232_v49   ;;  %617 = vperm.xlu0 %2319, %v231_v50  }
  0x6b   : > { %632 = vperm.xlu1 %2320, %v234_v51   ;;  %627 = vperm.xlu0 %2319, %v233_v52   ;;  %v258_v52 = vld [vmem:[%s2818_s20 + $0x58] sm:$0xff] }
  0x6f   : > { %642 = vperm.xlu1 %2320, %v236_v53   ;;  %637 = vperm.xlu0 %2319, %v235_v54   ;;  %v2060_v53 = vld [vmem:[%s2818_s20 + $0x450] sm:$0xff]  ;;  %v2061_v54 = vld [vmem:[%s2818_s20 + $0x458] sm:$0xff] }
  0x73   : > { %652 = vperm.xlu1 %2320, %v238_v55   ;;  %647 = vperm.xlu0 %2319, %v237_v56  }
  0x77   : > { %662 = vperm.xlu1 %2320, %v240_v57   ;;  %657 = vperm.xlu0 %2319, %v239_v58  }
  0x7b   : > { %672 = vperm.xlu1 %2320, %v242_v59   ;;  %667 = vperm.xlu0 %2319, %v241_v60   ;;  %v259_v59 = vld [vmem:[%s2818_s20 + $0x60] sm:$0xff] }
  0x7f   : > { %682 = vperm.xlu1 %2320, %v244_v61   ;;  %677 = vperm.xlu0 %2319, %v243_v62  }
  0x83   : > { %692 = vperm.xlu1 %2320, %v246_v63   ;;  %687 = vperm.xlu0 %2319, %v245_v0  }
  0x86   : > { %v388_v1 = vpop.permute.xlu1 %387  ;;  %v378_v2 = vpop.permute.xlu0 %377 }
  0x87   : > { %v695_v17 = vmul.f32 %v378_v2, %v247_v3  ;;  %v696_v18 = vmul.f32 %v378_v2, %v248_v4  ;;  %v1402_v19 = vmul.f32 %v2050_v6, %v378_v2  ;;  %v1403_v20 = vmul.f32 %v2051_v7, %v378_v2  ;;  %v260_v2 = vld [vmem:[%s2818_s20 + $0x68] sm:$0xff]  ;;  %v2062_v3 = vld [vmem:[%s2818_s20 + $0x460] sm:$0xff] }
  0x88   : > { %v699_v29 = vmul.f32 %v388_v1, %v251_v5  ;;  %v700_v30 = vmul.f32 %v388_v1, %v252_v12  ;;  %v1406_v31 = vmul.f32 %v2054_v13, %v388_v1  ;;  %v1407_v32 = vmul.f32 %v2055_v14, %v388_v1  ;;  %v2063_v4 = vld [vmem:[%s2818_s20 + $0x468] sm:$0xff]  ;;  %v262_v14 = vld [vmem:[%s2818_s20 + $0x78] sm:$0xff] }
  0x8a   : > { %v393_v15 = vpop.permute.xlu1 %392  ;;  %v383_v16 = vpop.permute.xlu0 %382 }
  0x8b   : > { %v697_v25 = vmul.f32 %v383_v16, %v249_v8  ;;  %v698_v26 = vmul.f32 %v383_v16, %v250_v9  ;;  %v1404_v27 = vmul.f32 %v2052_v10, %v383_v16  ;;  %v1405_v28 = vmul.f32 %v2053_v11, %v383_v16  ;;  %v261_v9 = vld [vmem:[%s2818_s20 + $0x70] sm:$0xff]  ;;  %v2065_v16 = vld [vmem:[%s2818_s20 + $0x478] sm:$0xff] }
  0x8c   : > { %v701_v43 = vmul.f32 %v393_v15, %v253_v21  ;;  %v702_v44 = vmul.f32 %v393_v15, %v254_v22  ;;  %v1408_v45 = vmul.f32 %v2056_v23, %v393_v15  ;;  %v1409_v46 = vmul.f32 %v2057_v24, %v393_v15  ;;  %v2064_v15 = vld [vmem:[%s2818_s20 + $0x470] sm:$0xff]  ;;  %v263_v21 = vld [vmem:[%s2818_s20 + $0x80] sm:$0xff] }
  0x8d   : > { %v823_v34 = vadd.f32 %v697_v25, %v695_v17  ;;  %v892_v35 = vadd.f32 %v698_v26, %v696_v18  ;;  %v1530_v36 = vadd.f32 %v1404_v27, %v1402_v19  ;;  %v1599_v37 = vadd.f32 %v1405_v28, %v1403_v20  ;;  %v264_v28 = vld [vmem:[%s2818_s20 + $0x88] sm:$0xff] }
  0x8e   : > { %v403_v38 = vpop.permute.xlu1 %402  ;;  %v398_v39 = vpop.permute.xlu0 %397 }
  0x8f   : > { %v824_v48 = vadd.f32 %v823_v34, %v699_v29  ;;  %v893_v49 = vadd.f32 %v892_v35, %v700_v30  ;;  %v1531_v50 = vadd.f32 %v1530_v36, %v1406_v31  ;;  %v1600_v51 = vadd.f32 %v1599_v37, %v1407_v32  ;;  %v2066_v29 = vld [vmem:[%s2818_s20 + $0x480] sm:$0xff]  ;;  %v2067_v30 = vld [vmem:[%s2818_s20 + $0x488] sm:$0xff]  ;;  %v265_v35 = vld [vmem:[%s2818_s20 + $0x90] sm:$0xff] }
  0x90   : > { %v703_v55 = vmul.f32 %v398_v39, %v255_v33  ;;  %v704_v56 = vmul.f32 %v398_v39, %v256_v40  ;;  %v1410_v57 = vmul.f32 %v2058_v41, %v398_v39  ;;  %v1411_v58 = vmul.f32 %v2059_v42, %v398_v39  ;;  %v266_v40 = vld [vmem:[%s2818_s20 + $0x98] sm:$0xff]  ;;  %v2068_v41 = vld [vmem:[%s2818_s20 + $0x490] sm:$0xff] }
  0x91   : > { %v825_v60 = vadd.f32 %v824_v48, %v701_v43  ;;  %v894_v61 = vadd.f32 %v893_v49, %v702_v44  ;;  %v1532_v62 = vadd.f32 %v1531_v50, %v1408_v45  ;;  %v1601_v63 = vadd.f32 %v1600_v51, %v1409_v46  ;;  %v2069_v42 = vld [vmem:[%s2818_s20 + $0x498] sm:$0xff] }
  0x92   : > { %v413_v0 = vpop.permute.xlu1 %412  ;;  %v408_v1 = vpop.permute.xlu0 %407  ;;  %v705_v5 = vmul.f32 %v403_v38, %v257_v47  ;;  %v706_v6 = vmul.f32 %v403_v38, %v258_v52  ;;  %v1412_v7 = vmul.f32 %v2060_v53, %v403_v38  ;;  %v1413_v8 = vmul.f32 %v2061_v54, %v403_v38  ;;  %v267_v47 = vld [vmem:[%s2818_s20 + $0xa0] sm:$0xff]  ;;  %v268_v54 = vld [vmem:[%s2818_s20 + $0xa8] sm:$0xff] }
  0x93   : > { %v826_v10 = vadd.f32 %v825_v60, %v703_v55  ;;  %v895_v11 = vadd.f32 %v894_v61, %v704_v56  ;;  %v1533_v12 = vadd.f32 %v1532_v62, %v1410_v57  ;;  %v1602_v13 = vadd.f32 %v1601_v63, %v1411_v58  ;;  %v2070_v55 = vld [vmem:[%s2818_s20 + $0x4a0] sm:$0xff]  ;;  %v2071_v56 = vld [vmem:[%s2818_s20 + $0x4a8] sm:$0xff]  ;;  %v269_v61 = vld [vmem:[%s2818_s20 + $0xb0] sm:$0xff] }
  0x94   : > { %v707_v17 = vmul.f32 %v408_v1, %v259_v59  ;;  %v708_v18 = vmul.f32 %v408_v1, %v260_v2  ;;  %v1414_v19 = vmul.f32 %v2062_v3, %v408_v1  ;;  %v1415_v20 = vmul.f32 %v2063_v4, %v408_v1  ;;  %v270_v2 = vld [vmem:[%s2818_s20 + $0xb8] sm:$0xff]  ;;  %v2072_v3 = vld [vmem:[%s2818_s20 + $0x4b0] sm:$0xff] }
  0x95   : > { %v827_v22 = vadd.f32 %v826_v10, %v705_v5  ;;  %v896_v23 = vadd.f32 %v895_v11, %v706_v6  ;;  %v1534_v24 = vadd.f32 %v1533_v12, %v1412_v7  ;;  %v1603_v25 = vadd.f32 %v1602_v13, %v1413_v8  ;;  %v2073_v4 = vld [vmem:[%s2818_s20 + $0x4b8] sm:$0xff] }
  0x96   : > { %v423_v26 = vpop.permute.xlu1 %422  ;;  %v418_v27 = vpop.permute.xlu0 %417  ;;  %v709_v31 = vmul.f32 %v413_v0, %v261_v9  ;;  %v710_v32 = vmul.f32 %v413_v0, %v262_v14  ;;  %v1416_v33 = vmul.f32 %v2064_v15, %v413_v0  ;;  %v1417_v34 = vmul.f32 %v2065_v16, %v413_v0  ;;  %v271_v9 = vld [vmem:[%s2818_s20 + $0xc0] sm:$0xff]  ;;  %v272_v16 = vld [vmem:[%s2818_s20 + $0xc8] sm:$0xff] }
  0x97   : > { %v828_v36 = vadd.f32 %v827_v22, %v707_v17  ;;  %v897_v37 = vadd.f32 %v896_v23, %v708_v18  ;;  %v1535_v38 = vadd.f32 %v1534_v24, %v1414_v19  ;;  %v1604_v39 = vadd.f32 %v1603_v25, %v1415_v20  ;;  %v2074_v17 = vld [vmem:[%s2818_s20 + $0x4c0] sm:$0xff]  ;;  %v2075_v18 = vld [vmem:[%s2818_s20 + $0x4c8] sm:$0xff]  ;;  %v273_v23 = vld [vmem:[%s2818_s20 + $0xd0] sm:$0xff] }
  0x98   : > { %v711_v43 = vmul.f32 %v418_v27, %v263_v21  ;;  %v712_v44 = vmul.f32 %v418_v27, %v264_v28  ;;  %v1418_v45 = vmul.f32 %v2066_v29, %v418_v27  ;;  %v1419_v46 = vmul.f32 %v2067_v30, %v418_v27  ;;  %v274_v28 = vld [vmem:[%s2818_s20 + $0xd8] sm:$0xff]  ;;  %v2076_v29 = vld [vmem:[%s2818_s20 + $0x4d0] sm:$0xff] }
  0x99   : > { %v829_v48 = vadd.f32 %v828_v36, %v709_v31  ;;  %v898_v49 = vadd.f32 %v897_v37, %v710_v32  ;;  %v1536_v50 = vadd.f32 %v1535_v38, %v1416_v33  ;;  %v1605_v51 = vadd.f32 %v1604_v39, %v1417_v34  ;;  %v2077_v30 = vld [vmem:[%s2818_s20 + $0x4d8] sm:$0xff] }
  0x9a   : > { %v433_v52 = vpop.permute.xlu1 %432  ;;  %v428_v53 = vpop.permute.xlu0 %427  ;;  %v713_v57 = vmul.f32 %v423_v26, %v265_v35  ;;  %v714_v58 = vmul.f32 %v423_v26, %v266_v40  ;;  %v1420_v59 = vmul.f32 %v2068_v41, %v423_v26  ;;  %v1421_v60 = vmul.f32 %v2069_v42, %v423_v26  ;;  %v275_v35 = vld [vmem:[%s2818_s20 + $0xe0] sm:$0xff]  ;;  %v276_v42 = vld [vmem:[%s2818_s20 + $0xe8] sm:$0xff] }
  0x9b   : > { %v830_v62 = vadd.f32 %v829_v48, %v711_v43  ;;  %v899_v63 = vadd.f32 %v898_v49, %v712_v44  ;;  %v1537_v0 = vadd.f32 %v1536_v50, %v1418_v45  ;;  %v1606_v1 = vadd.f32 %v1605_v51, %v1419_v46  ;;  %v2078_v43 = vld [vmem:[%s2818_s20 + $0x4e0] sm:$0xff]  ;;  %v2079_v44 = vld [vmem:[%s2818_s20 + $0x4e8] sm:$0xff]  ;;  %v277_v49 = vld [vmem:[%s2818_s20 + $0xf0] sm:$0xff] }
  0x9c   : > { %v715_v5 = vmul.f32 %v428_v53, %v267_v47  ;;  %v716_v6 = vmul.f32 %v428_v53, %v268_v54  ;;  %v1422_v7 = vmul.f32 %v2070_v55, %v428_v53  ;;  %v1423_v8 = vmul.f32 %v2071_v56, %v428_v53  ;;  %v278_v54 = vld [vmem:[%s2818_s20 + $0xf8] sm:$0xff]  ;;  %v2080_v55 = vld [vmem:[%s2818_s20 + $0x4f0] sm:$0xff] }
  0x9d   : > { %v831_v10 = vadd.f32 %v830_v62, %v713_v57  ;;  %v900_v11 = vadd.f32 %v899_v63, %v714_v58  ;;  %v1538_v12 = vadd.f32 %v1537_v0, %v1420_v59  ;;  %v1607_v13 = vadd.f32 %v1606_v1, %v1421_v60  ;;  %v2081_v56 = vld [vmem:[%s2818_s20 + $0x4f8] sm:$0xff] }
  0x9e   : > { %v443_v14 = vpop.permute.xlu1 %442  ;;  %v438_v15 = vpop.permute.xlu0 %437  ;;  %v717_v19 = vmul.f32 %v433_v52, %v269_v61  ;;  %v718_v20 = vmul.f32 %v433_v52, %v270_v2  ;;  %v1424_v21 = vmul.f32 %v2072_v3, %v433_v52  ;;  %v1425_v22 = vmul.f32 %v2073_v4, %v433_v52  ;;  %v279_v61 = vld [vmem:[%s2818_s20 + $0x100] sm:$0xff]  ;;  %v280_v4 = vld [vmem:[%s2818_s20 + $0x108] sm:$0xff] }
  0x9f   : > { %v832_v24 = vadd.f32 %v831_v10, %v715_v5  ;;  %v901_v25 = vadd.f32 %v900_v11, %v716_v6  ;;  %v1539_v26 = vadd.f32 %v1538_v12, %v1422_v7  ;;  %v1608_v27 = vadd.f32 %v1607_v13, %v1423_v8  ;;  %v2082_v5 = vld [vmem:[%s2818_s20 + $0x500] sm:$0xff]  ;;  %v2083_v6 = vld [vmem:[%s2818_s20 + $0x508] sm:$0xff]  ;;  %v281_v11 = vld [vmem:[%s2818_s20 + $0x110] sm:$0xff] }
  0xa0   : > { %v719_v31 = vmul.f32 %v438_v15, %v271_v9  ;;  %v720_v32 = vmul.f32 %v438_v15, %v272_v16  ;;  %v1426_v33 = vmul.f32 %v2074_v17, %v438_v15  ;;  %v1427_v34 = vmul.f32 %v2075_v18, %v438_v15  ;;  %v282_v16 = vld [vmem:[%s2818_s20 + $0x118] sm:$0xff]  ;;  %v2084_v17 = vld [vmem:[%s2818_s20 + $0x510] sm:$0xff] }
  0xa1   : > { %v833_v36 = vadd.f32 %v832_v24, %v717_v19  ;;  %v902_v37 = vadd.f32 %v901_v25, %v718_v20  ;;  %v1540_v38 = vadd.f32 %v1539_v26, %v1424_v21  ;;  %v1609_v39 = vadd.f32 %v1608_v27, %v1425_v22  ;;  %v2085_v18 = vld [vmem:[%s2818_s20 + $0x518] sm:$0xff] }
  0xa2   : > { %v453_v40 = vpop.permute.xlu1 %452  ;;  %v448_v41 = vpop.permute.xlu0 %447  ;;  %v721_v45 = vmul.f32 %v443_v14, %v273_v23  ;;  %v722_v46 = vmul.f32 %v443_v14, %v274_v28  ;;  %v1428_v47 = vmul.f32 %v2076_v29, %v443_v14  ;;  %v1429_v48 = vmul.f32 %v2077_v30, %v443_v14  ;;  %v283_v23 = vld [vmem:[%s2818_s20 + $0x120] sm:$0xff]  ;;  %v284_v30 = vld [vmem:[%s2818_s20 + $0x128] sm:$0xff] }
  0xa3   : > { %v834_v50 = vadd.f32 %v833_v36, %v719_v31  ;;  %v903_v51 = vadd.f32 %v902_v37, %v720_v32  ;;  %v1541_v52 = vadd.f32 %v1540_v38, %v1426_v33  ;;  %v1610_v53 = vadd.f32 %v1609_v39, %v1427_v34  ;;  %v2086_v31 = vld [vmem:[%s2818_s20 + $0x520] sm:$0xff]  ;;  %v2087_v32 = vld [vmem:[%s2818_s20 + $0x528] sm:$0xff]  ;;  %v285_v37 = vld [vmem:[%s2818_s20 + $0x130] sm:$0xff] }
  0xa4   : > { %v723_v57 = vmul.f32 %v448_v41, %v275_v35  ;;  %v724_v58 = vmul.f32 %v448_v41, %v276_v42  ;;  %v1430_v59 = vmul.f32 %v2078_v43, %v448_v41  ;;  %v1431_v60 = vmul.f32 %v2079_v44, %v448_v41  ;;  %v286_v42 = vld [vmem:[%s2818_s20 + $0x138] sm:$0xff]  ;;  %v2088_v43 = vld [vmem:[%s2818_s20 + $0x530] sm:$0xff] }
  0xa5   : > { %v835_v62 = vadd.f32 %v834_v50, %v721_v45  ;;  %v904_v63 = vadd.f32 %v903_v51, %v722_v46  ;;  %v1542_v0 = vadd.f32 %v1541_v52, %v1428_v47  ;;  %v1611_v1 = vadd.f32 %v1610_v53, %v1429_v48  ;;  %v2089_v44 = vld [vmem:[%s2818_s20 + $0x538] sm:$0xff] }
  0xa6   : > { %v463_v2 = vpop.permute.xlu1 %462  ;;  %v458_v3 = vpop.permute.xlu0 %457  ;;  %v725_v7 = vmul.f32 %v453_v40, %v277_v49  ;;  %v726_v8 = vmul.f32 %v453_v40, %v278_v54  ;;  %v1432_v9 = vmul.f32 %v2080_v55, %v453_v40  ;;  %v1433_v10 = vmul.f32 %v2081_v56, %v453_v40  ;;  %v287_v49 = vld [vmem:[%s2818_s20 + $0x140] sm:$0xff]  ;;  %v288_v56 = vld [vmem:[%s2818_s20 + $0x148] sm:$0xff] }
  0xa7   : > { %v836_v12 = vadd.f32 %v835_v62, %v723_v57  ;;  %v905_v13 = vadd.f32 %v904_v63, %v724_v58  ;;  %v1543_v14 = vadd.f32 %v1542_v0, %v1430_v59  ;;  %v1612_v15 = vadd.f32 %v1611_v1, %v1431_v60  ;;  %v2090_v57 = vld [vmem:[%s2818_s20 + $0x540] sm:$0xff]  ;;  %v2091_v58 = vld [vmem:[%s2818_s20 + $0x548] sm:$0xff]  ;;  %v289_v63 = vld [vmem:[%s2818_s20 + $0x150] sm:$0xff] }
  0xa8   : > { %v727_v19 = vmul.f32 %v458_v3, %v279_v61  ;;  %v728_v20 = vmul.f32 %v458_v3, %v280_v4  ;;  %v1434_v21 = vmul.f32 %v2082_v5, %v458_v3  ;;  %v1435_v22 = vmul.f32 %v2083_v6, %v458_v3  ;;  %v290_v4 = vld [vmem:[%s2818_s20 + $0x158] sm:$0xff]  ;;  %v2092_v5 = vld [vmem:[%s2818_s20 + $0x550] sm:$0xff] }
  0xa9   : > { %v837_v24 = vadd.f32 %v836_v12, %v725_v7  ;;  %v906_v25 = vadd.f32 %v905_v13, %v726_v8  ;;  %v1544_v26 = vadd.f32 %v1543_v14, %v1432_v9  ;;  %v1613_v27 = vadd.f32 %v1612_v15, %v1433_v10  ;;  %v2093_v6 = vld [vmem:[%s2818_s20 + $0x558] sm:$0xff] }
  0xaa   : > { %v473_v28 = vpop.permute.xlu1 %472  ;;  %v468_v29 = vpop.permute.xlu0 %467  ;;  %v729_v33 = vmul.f32 %v463_v2, %v281_v11  ;;  %v730_v34 = vmul.f32 %v463_v2, %v282_v16  ;;  %v1436_v35 = vmul.f32 %v2084_v17, %v463_v2  ;;  %v1437_v36 = vmul.f32 %v2085_v18, %v463_v2  ;;  %v291_v11 = vld [vmem:[%s2818_s20 + $0x160] sm:$0xff]  ;;  %v292_v18 = vld [vmem:[%s2818_s20 + $0x168] sm:$0xff] }
  0xab   : > { %v838_v38 = vadd.f32 %v837_v24, %v727_v19  ;;  %v907_v39 = vadd.f32 %v906_v25, %v728_v20  ;;  %v1545_v40 = vadd.f32 %v1544_v26, %v1434_v21  ;;  %v1614_v41 = vadd.f32 %v1613_v27, %v1435_v22  ;;  %v2094_v19 = vld [vmem:[%s2818_s20 + $0x560] sm:$0xff]  ;;  %v2095_v20 = vld [vmem:[%s2818_s20 + $0x568] sm:$0xff]  ;;  %v293_v25 = vld [vmem:[%s2818_s20 + $0x170] sm:$0xff] }
  0xac   : > { %v731_v45 = vmul.f32 %v468_v29, %v283_v23  ;;  %v732_v46 = vmul.f32 %v468_v29, %v284_v30  ;;  %v1438_v47 = vmul.f32 %v2086_v31, %v468_v29  ;;  %v1439_v48 = vmul.f32 %v2087_v32, %v468_v29  ;;  %v294_v30 = vld [vmem:[%s2818_s20 + $0x178] sm:$0xff]  ;;  %v2096_v31 = vld [vmem:[%s2818_s20 + $0x570] sm:$0xff] }
  0xad   : > { %v839_v50 = vadd.f32 %v838_v38, %v729_v33  ;;  %v908_v51 = vadd.f32 %v907_v39, %v730_v34  ;;  %v1546_v52 = vadd.f32 %v1545_v40, %v1436_v35  ;;  %v1615_v53 = vadd.f32 %v1614_v41, %v1437_v36  ;;  %v2097_v32 = vld [vmem:[%s2818_s20 + $0x578] sm:$0xff] }
  0xae   : > { %v483_v54 = vpop.permute.xlu1 %482  ;;  %v478_v55 = vpop.permute.xlu0 %477  ;;  %v733_v59 = vmul.f32 %v473_v28, %v285_v37  ;;  %v734_v60 = vmul.f32 %v473_v28, %v286_v42  ;;  %v1440_v61 = vmul.f32 %v2088_v43, %v473_v28  ;;  %v1441_v62 = vmul.f32 %v2089_v44, %v473_v28  ;;  %v295_v37 = vld [vmem:[%s2818_s20 + $0x180] sm:$0xff]  ;;  %v296_v44 = vld [vmem:[%s2818_s20 + $0x188] sm:$0xff] }
  0xaf   : > { %v840_v0 = vadd.f32 %v839_v50, %v731_v45  ;;  %v909_v1 = vadd.f32 %v908_v51, %v732_v46  ;;  %v1547_v2 = vadd.f32 %v1546_v52, %v1438_v47  ;;  %v1616_v3 = vadd.f32 %v1615_v53, %v1439_v48  ;;  %v2098_v45 = vld [vmem:[%s2818_s20 + $0x580] sm:$0xff]  ;;  %v2099_v46 = vld [vmem:[%s2818_s20 + $0x588] sm:$0xff]  ;;  %v297_v51 = vld [vmem:[%s2818_s20 + $0x190] sm:$0xff] }
  0xb0   : > { %v735_v7 = vmul.f32 %v478_v55, %v287_v49  ;;  %v736_v8 = vmul.f32 %v478_v55, %v288_v56  ;;  %v1442_v9 = vmul.f32 %v2090_v57, %v478_v55  ;;  %v1443_v10 = vmul.f32 %v2091_v58, %v478_v55  ;;  %v298_v56 = vld [vmem:[%s2818_s20 + $0x198] sm:$0xff]  ;;  %v2100_v57 = vld [vmem:[%s2818_s20 + $0x590] sm:$0xff] }
  0xb1   : > { %v841_v12 = vadd.f32 %v840_v0, %v733_v59  ;;  %v910_v13 = vadd.f32 %v909_v1, %v734_v60  ;;  %v1548_v14 = vadd.f32 %v1547_v2, %v1440_v61  ;;  %v1617_v15 = vadd.f32 %v1616_v3, %v1441_v62  ;;  %v2101_v58 = vld [vmem:[%s2818_s20 + $0x598] sm:$0xff] }
  0xb2   : > { %v493_v16 = vpop.permute.xlu1 %492  ;;  %v488_v17 = vpop.permute.xlu0 %487  ;;  %v737_v21 = vmul.f32 %v483_v54, %v289_v63  ;;  %v738_v22 = vmul.f32 %v483_v54, %v290_v4  ;;  %v1444_v23 = vmul.f32 %v2092_v5, %v483_v54  ;;  %v1445_v24 = vmul.f32 %v2093_v6, %v483_v54  ;;  %v299_v63 = vld [vmem:[%s2818_s20 + $0x1a0] sm:$0xff]  ;;  %v300_v6 = vld [vmem:[%s2818_s20 + $0x1a8] sm:$0xff] }
  0xb3   : > { %v842_v26 = vadd.f32 %v841_v12, %v735_v7  ;;  %v911_v27 = vadd.f32 %v910_v13, %v736_v8  ;;  %v1549_v28 = vadd.f32 %v1548_v14, %v1442_v9  ;;  %v1618_v29 = vadd.f32 %v1617_v15, %v1443_v10  ;;  %v2102_v7 = vld [vmem:[%s2818_s20 + $0x5a0] sm:$0xff]  ;;  %v2103_v8 = vld [vmem:[%s2818_s20 + $0x5a8] sm:$0xff]  ;;  %v301_v13 = vld [vmem:[%s2818_s20 + $0x1b0] sm:$0xff] }
  0xb4   : > { %v739_v33 = vmul.f32 %v488_v17, %v291_v11  ;;  %v740_v34 = vmul.f32 %v488_v17, %v292_v18  ;;  %v1446_v35 = vmul.f32 %v2094_v19, %v488_v17  ;;  %v1447_v36 = vmul.f32 %v2095_v20, %v488_v17  ;;  %v302_v18 = vld [vmem:[%s2818_s20 + $0x1b8] sm:$0xff]  ;;  %v2104_v19 = vld [vmem:[%s2818_s20 + $0x5b0] sm:$0xff] }
  0xb5   : > { %v843_v38 = vadd.f32 %v842_v26, %v737_v21  ;;  %v912_v39 = vadd.f32 %v911_v27, %v738_v22  ;;  %v1550_v40 = vadd.f32 %v1549_v28, %v1444_v23  ;;  %v1619_v41 = vadd.f32 %v1618_v29, %v1445_v24  ;;  %v2105_v20 = vld [vmem:[%s2818_s20 + $0x5b8] sm:$0xff] }
  0xb6   : > { %v503_v42 = vpop.permute.xlu1 %502  ;;  %v498_v43 = vpop.permute.xlu0 %497  ;;  %v741_v47 = vmul.f32 %v493_v16, %v293_v25  ;;  %v742_v48 = vmul.f32 %v493_v16, %v294_v30  ;;  %v1448_v49 = vmul.f32 %v2096_v31, %v493_v16  ;;  %v1449_v50 = vmul.f32 %v2097_v32, %v493_v16  ;;  %v303_v25 = vld [vmem:[%s2818_s20 + $0x1c0] sm:$0xff]  ;;  %v304_v32 = vld [vmem:[%s2818_s20 + $0x1c8] sm:$0xff] }
  0xb7   : > { %v844_v52 = vadd.f32 %v843_v38, %v739_v33  ;;  %v913_v53 = vadd.f32 %v912_v39, %v740_v34  ;;  %v1551_v54 = vadd.f32 %v1550_v40, %v1446_v35  ;;  %v1620_v55 = vadd.f32 %v1619_v41, %v1447_v36  ;;  %v2106_v33 = vld [vmem:[%s2818_s20 + $0x5c0] sm:$0xff]  ;;  %v2107_v34 = vld [vmem:[%s2818_s20 + $0x5c8] sm:$0xff]  ;;  %v305_v39 = vld [vmem:[%s2818_s20 + $0x1d0] sm:$0xff] }
  0xb8   : > { %v743_v59 = vmul.f32 %v498_v43, %v295_v37  ;;  %v744_v60 = vmul.f32 %v498_v43, %v296_v44  ;;  %v1450_v61 = vmul.f32 %v2098_v45, %v498_v43  ;;  %v1451_v62 = vmul.f32 %v2099_v46, %v498_v43  ;;  %v306_v44 = vld [vmem:[%s2818_s20 + $0x1d8] sm:$0xff]  ;;  %v2108_v45 = vld [vmem:[%s2818_s20 + $0x5d0] sm:$0xff] }
  0xb9   : > { %v845_v0 = vadd.f32 %v844_v52, %v741_v47  ;;  %v914_v1 = vadd.f32 %v913_v53, %v742_v48  ;;  %v1552_v2 = vadd.f32 %v1551_v54, %v1448_v49  ;;  %v1621_v3 = vadd.f32 %v1620_v55, %v1449_v50  ;;  %v2109_v46 = vld [vmem:[%s2818_s20 + $0x5d8] sm:$0xff] }
  0xba   : > { %v513_v4 = vpop.permute.xlu1 %512  ;;  %v508_v5 = vpop.permute.xlu0 %507  ;;  %v745_v9 = vmul.f32 %v503_v42, %v297_v51  ;;  %v746_v10 = vmul.f32 %v503_v42, %v298_v56  ;;  %v1452_v11 = vmul.f32 %v2100_v57, %v503_v42  ;;  %v1453_v12 = vmul.f32 %v2101_v58, %v503_v42  ;;  %v307_v51 = vld [vmem:[%s2818_s20 + $0x1e0] sm:$0xff]  ;;  %v308_v58 = vld [vmem:[%s2818_s20 + $0x1e8] sm:$0xff] }
  0xbb   : > { %v846_v14 = vadd.f32 %v845_v0, %v743_v59  ;;  %v915_v15 = vadd.f32 %v914_v1, %v744_v60  ;;  %v1553_v16 = vadd.f32 %v1552_v2, %v1450_v61  ;;  %v1622_v17 = vadd.f32 %v1621_v3, %v1451_v62  ;;  %v2110_v59 = vld [vmem:[%s2818_s20 + $0x5e0] sm:$0xff]  ;;  %v2111_v60 = vld [vmem:[%s2818_s20 + $0x5e8] sm:$0xff]  ;;  %v309_v1 = vld [vmem:[%s2818_s20 + $0x1f0] sm:$0xff] }
  0xbc   : > { %v747_v21 = vmul.f32 %v508_v5, %v299_v63  ;;  %v748_v22 = vmul.f32 %v508_v5, %v300_v6  ;;  %v1454_v23 = vmul.f32 %v2102_v7, %v508_v5  ;;  %v1455_v24 = vmul.f32 %v2103_v8, %v508_v5  ;;  %v310_v6 = vld [vmem:[%s2818_s20 + $0x1f8] sm:$0xff]  ;;  %v2112_v7 = vld [vmem:[%s2818_s20 + $0x5f0] sm:$0xff] }
  0xbd   : > { %v847_v26 = vadd.f32 %v846_v14, %v745_v9  ;;  %v916_v27 = vadd.f32 %v915_v15, %v746_v10  ;;  %v1554_v28 = vadd.f32 %v1553_v16, %v1452_v11  ;;  %v1623_v29 = vadd.f32 %v1622_v17, %v1453_v12  ;;  %v2113_v8 = vld [vmem:[%s2818_s20 + $0x5f8] sm:$0xff] }
  0xbe   : > { %v523_v30 = vpop.permute.xlu1 %522  ;;  %v518_v31 = vpop.permute.xlu0 %517  ;;  %v749_v35 = vmul.f32 %v513_v4, %v301_v13  ;;  %v750_v36 = vmul.f32 %v513_v4, %v302_v18  ;;  %v1456_v37 = vmul.f32 %v2104_v19, %v513_v4  ;;  %v1457_v38 = vmul.f32 %v2105_v20, %v513_v4  ;;  %v311_v13 = vld [vmem:[%s2818_s20 + $0x200] sm:$0xff]  ;;  %v312_v20 = vld [vmem:[%s2818_s20 + $0x208] sm:$0xff] }
  0xbf   : > { %v848_v40 = vadd.f32 %v847_v26, %v747_v21  ;;  %v917_v41 = vadd.f32 %v916_v27, %v748_v22  ;;  %v1555_v42 = vadd.f32 %v1554_v28, %v1454_v23  ;;  %v1624_v43 = vadd.f32 %v1623_v29, %v1455_v24  ;;  %v2114_v21 = vld [vmem:[%s2818_s20 + $0x600] sm:$0xff]  ;;  %v2115_v22 = vld [vmem:[%s2818_s20 + $0x608] sm:$0xff]  ;;  %v313_v27 = vld [vmem:[%s2818_s20 + $0x210] sm:$0xff] }
  0xc0   : > { %v751_v47 = vmul.f32 %v518_v31, %v303_v25  ;;  %v752_v48 = vmul.f32 %v518_v31, %v304_v32  ;;  %v1458_v49 = vmul.f32 %v2106_v33, %v518_v31  ;;  %v1459_v50 = vmul.f32 %v2107_v34, %v518_v31  ;;  %v314_v32 = vld [vmem:[%s2818_s20 + $0x218] sm:$0xff]  ;;  %v2116_v33 = vld [vmem:[%s2818_s20 + $0x610] sm:$0xff] }
  0xc1   : > { %v849_v52 = vadd.f32 %v848_v40, %v749_v35  ;;  %v918_v53 = vadd.f32 %v917_v41, %v750_v36  ;;  %v1556_v54 = vadd.f32 %v1555_v42, %v1456_v37  ;;  %v1625_v55 = vadd.f32 %v1624_v43, %v1457_v38  ;;  %v2117_v34 = vld [vmem:[%s2818_s20 + $0x618] sm:$0xff] }
  0xc2   : > { %v533_v56 = vpop.permute.xlu1 %532  ;;  %v528_v57 = vpop.permute.xlu0 %527  ;;  %v753_v61 = vmul.f32 %v523_v30, %v305_v39  ;;  %v754_v62 = vmul.f32 %v523_v30, %v306_v44  ;;  %v1460_v63 = vmul.f32 %v2108_v45, %v523_v30  ;;  %v1461_v0 = vmul.f32 %v2109_v46, %v523_v30  ;;  %v315_v39 = vld [vmem:[%s2818_s20 + $0x220] sm:$0xff]  ;;  %v316_v46 = vld [vmem:[%s2818_s20 + $0x228] sm:$0xff] }
  0xc3   : > { %v850_v2 = vadd.f32 %v849_v52, %v751_v47  ;;  %v919_v3 = vadd.f32 %v918_v53, %v752_v48  ;;  %v1557_v4 = vadd.f32 %v1556_v54, %v1458_v49  ;;  %v1626_v5 = vadd.f32 %v1625_v55, %v1459_v50  ;;  %v2118_v47 = vld [vmem:[%s2818_s20 + $0x620] sm:$0xff]  ;;  %v2119_v48 = vld [vmem:[%s2818_s20 + $0x628] sm:$0xff]  ;;  %v317_v53 = vld [vmem:[%s2818_s20 + $0x230] sm:$0xff] }
  0xc4   : > { %v755_v9 = vmul.f32 %v528_v57, %v307_v51  ;;  %v756_v10 = vmul.f32 %v528_v57, %v308_v58  ;;  %v1462_v11 = vmul.f32 %v2110_v59, %v528_v57  ;;  %v1463_v12 = vmul.f32 %v2111_v60, %v528_v57  ;;  %v318_v58 = vld [vmem:[%s2818_s20 + $0x238] sm:$0xff]  ;;  %v2120_v59 = vld [vmem:[%s2818_s20 + $0x630] sm:$0xff] }
  0xc5   : > { %v851_v14 = vadd.f32 %v850_v2, %v753_v61  ;;  %v920_v15 = vadd.f32 %v919_v3, %v754_v62  ;;  %v1558_v16 = vadd.f32 %v1557_v4, %v1460_v63  ;;  %v1627_v17 = vadd.f32 %v1626_v5, %v1461_v0  ;;  %v2121_v60 = vld [vmem:[%s2818_s20 + $0x638] sm:$0xff] }
  0xc6   : > { %v543_v18 = vpop.permute.xlu1 %542  ;;  %v538_v19 = vpop.permute.xlu0 %537  ;;  %v757_v23 = vmul.f32 %v533_v56, %v309_v1  ;;  %v758_v24 = vmul.f32 %v533_v56, %v310_v6  ;;  %v1464_v25 = vmul.f32 %v2112_v7, %v533_v56  ;;  %v1465_v26 = vmul.f32 %v2113_v8, %v533_v56  ;;  %v319_v1 = vld [vmem:[%s2818_s20 + $0x240] sm:$0xff]  ;;  %v320_v8 = vld [vmem:[%s2818_s20 + $0x248] sm:$0xff] }
  0xc7   : > { %v852_v28 = vadd.f32 %v851_v14, %v755_v9  ;;  %v921_v29 = vadd.f32 %v920_v15, %v756_v10  ;;  %v1559_v30 = vadd.f32 %v1558_v16, %v1462_v11  ;;  %v1628_v31 = vadd.f32 %v1627_v17, %v1463_v12  ;;  %v2122_v9 = vld [vmem:[%s2818_s20 + $0x640] sm:$0xff]  ;;  %v2123_v10 = vld [vmem:[%s2818_s20 + $0x648] sm:$0xff]  ;;  %v321_v15 = vld [vmem:[%s2818_s20 + $0x250] sm:$0xff] }
  0xc8   : > { %v759_v35 = vmul.f32 %v538_v19, %v311_v13  ;;  %v760_v36 = vmul.f32 %v538_v19, %v312_v20  ;;  %v1466_v37 = vmul.f32 %v2114_v21, %v538_v19  ;;  %v1467_v38 = vmul.f32 %v2115_v22, %v538_v19  ;;  %v322_v20 = vld [vmem:[%s2818_s20 + $0x258] sm:$0xff]  ;;  %v2124_v21 = vld [vmem:[%s2818_s20 + $0x650] sm:$0xff] }
  0xc9   : > { %v853_v40 = vadd.f32 %v852_v28, %v757_v23  ;;  %v922_v41 = vadd.f32 %v921_v29, %v758_v24  ;;  %v1560_v42 = vadd.f32 %v1559_v30, %v1464_v25  ;;  %v1629_v43 = vadd.f32 %v1628_v31, %v1465_v26  ;;  %v2125_v22 = vld [vmem:[%s2818_s20 + $0x658] sm:$0xff] }
  0xca   : > { %v553_v44 = vpop.permute.xlu1 %552  ;;  %v548_v45 = vpop.permute.xlu0 %547  ;;  %v761_v49 = vmul.f32 %v543_v18, %v313_v27  ;;  %v762_v50 = vmul.f32 %v543_v18, %v314_v32  ;;  %v1468_v51 = vmul.f32 %v2116_v33, %v543_v18  ;;  %v1469_v52 = vmul.f32 %v2117_v34, %v543_v18  ;;  %v323_v27 = vld [vmem:[%s2818_s20 + $0x260] sm:$0xff]  ;;  %v324_v34 = vld [vmem:[%s2818_s20 + $0x268] sm:$0xff] }
  0xcb   : > { %v854_v54 = vadd.f32 %v853_v40, %v759_v35  ;;  %v923_v55 = vadd.f32 %v922_v41, %v760_v36  ;;  %v1561_v56 = vadd.f32 %v1560_v42, %v1466_v37  ;;  %v1630_v57 = vadd.f32 %v1629_v43, %v1467_v38  ;;  %v2126_v35 = vld [vmem:[%s2818_s20 + $0x660] sm:$0xff]  ;;  %v2127_v36 = vld [vmem:[%s2818_s20 + $0x668] sm:$0xff]  ;;  %v325_v41 = vld [vmem:[%s2818_s20 + $0x270] sm:$0xff] }
  0xcc   : > { %v763_v61 = vmul.f32 %v548_v45, %v315_v39  ;;  %v764_v62 = vmul.f32 %v548_v45, %v316_v46  ;;  %v1470_v63 = vmul.f32 %v2118_v47, %v548_v45  ;;  %v1471_v0 = vmul.f32 %v2119_v48, %v548_v45  ;;  %v326_v46 = vld [vmem:[%s2818_s20 + $0x278] sm:$0xff]  ;;  %v2128_v47 = vld [vmem:[%s2818_s20 + $0x670] sm:$0xff] }
  0xcd   : > { %v855_v2 = vadd.f32 %v854_v54, %v761_v49  ;;  %v924_v3 = vadd.f32 %v923_v55, %v762_v50  ;;  %v1562_v4 = vadd.f32 %v1561_v56, %v1468_v51  ;;  %v1631_v5 = vadd.f32 %v1630_v57, %v1469_v52  ;;  %v2129_v48 = vld [vmem:[%s2818_s20 + $0x678] sm:$0xff] }
  0xce   : > { %v563_v6 = vpop.permute.xlu1 %562  ;;  %v558_v7 = vpop.permute.xlu0 %557  ;;  %v765_v11 = vmul.f32 %v553_v44, %v317_v53  ;;  %v766_v12 = vmul.f32 %v553_v44, %v318_v58  ;;  %v1472_v13 = vmul.f32 %v2120_v59, %v553_v44  ;;  %v1473_v14 = vmul.f32 %v2121_v60, %v553_v44  ;;  %v327_v53 = vld [vmem:[%s2818_s20 + $0x280] sm:$0xff]  ;;  %v328_v60 = vld [vmem:[%s2818_s20 + $0x288] sm:$0xff] }
  0xcf   : > { %v856_v16 = vadd.f32 %v855_v2, %v763_v61  ;;  %v925_v17 = vadd.f32 %v924_v3, %v764_v62  ;;  %v1563_v18 = vadd.f32 %v1562_v4, %v1470_v63  ;;  %v1632_v19 = vadd.f32 %v1631_v5, %v1471_v0  ;;  %v2130_v61 = vld [vmem:[%s2818_s20 + $0x680] sm:$0xff]  ;;  %v2131_v62 = vld [vmem:[%s2818_s20 + $0x688] sm:$0xff]  ;;  %v329_v3 = vld [vmem:[%s2818_s20 + $0x290] sm:$0xff] }
  0xd0   : > { %v767_v23 = vmul.f32 %v558_v7, %v319_v1  ;;  %v768_v24 = vmul.f32 %v558_v7, %v320_v8  ;;  %v1474_v25 = vmul.f32 %v2122_v9, %v558_v7  ;;  %v1475_v26 = vmul.f32 %v2123_v10, %v558_v7  ;;  %v330_v8 = vld [vmem:[%s2818_s20 + $0x298] sm:$0xff]  ;;  %v2132_v9 = vld [vmem:[%s2818_s20 + $0x690] sm:$0xff] }
  0xd1   : > { %v857_v28 = vadd.f32 %v856_v16, %v765_v11  ;;  %v926_v29 = vadd.f32 %v925_v17, %v766_v12  ;;  %v1564_v30 = vadd.f32 %v1563_v18, %v1472_v13  ;;  %v1633_v31 = vadd.f32 %v1632_v19, %v1473_v14  ;;  %v2133_v10 = vld [vmem:[%s2818_s20 + $0x698] sm:$0xff] }
  0xd2   : > { %v573_v32 = vpop.permute.xlu1 %572  ;;  %v568_v33 = vpop.permute.xlu0 %567  ;;  %v769_v37 = vmul.f32 %v563_v6, %v321_v15  ;;  %v770_v38 = vmul.f32 %v563_v6, %v322_v20  ;;  %v1476_v39 = vmul.f32 %v2124_v21, %v563_v6  ;;  %v1477_v40 = vmul.f32 %v2125_v22, %v563_v6  ;;  %v331_v15 = vld [vmem:[%s2818_s20 + $0x2a0] sm:$0xff]  ;;  %v332_v22 = vld [vmem:[%s2818_s20 + $0x2a8] sm:$0xff] }
  0xd3   : > { %v858_v42 = vadd.f32 %v857_v28, %v767_v23  ;;  %v927_v43 = vadd.f32 %v926_v29, %v768_v24  ;;  %v1565_v44 = vadd.f32 %v1564_v30, %v1474_v25  ;;  %v1634_v45 = vadd.f32 %v1633_v31, %v1475_v26  ;;  %v2134_v23 = vld [vmem:[%s2818_s20 + $0x6a0] sm:$0xff]  ;;  %v2135_v24 = vld [vmem:[%s2818_s20 + $0x6a8] sm:$0xff]  ;;  %v333_v29 = vld [vmem:[%s2818_s20 + $0x2b0] sm:$0xff] }
  0xd4   : > { %v771_v49 = vmul.f32 %v568_v33, %v323_v27  ;;  %v772_v50 = vmul.f32 %v568_v33, %v324_v34  ;;  %v1478_v51 = vmul.f32 %v2126_v35, %v568_v33  ;;  %v1479_v52 = vmul.f32 %v2127_v36, %v568_v33  ;;  %v334_v34 = vld [vmem:[%s2818_s20 + $0x2b8] sm:$0xff]  ;;  %v2136_v35 = vld [vmem:[%s2818_s20 + $0x6b0] sm:$0xff] }
  0xd5   : > { %v859_v54 = vadd.f32 %v858_v42, %v769_v37  ;;  %v928_v55 = vadd.f32 %v927_v43, %v770_v38  ;;  %v1566_v56 = vadd.f32 %v1565_v44, %v1476_v39  ;;  %v1635_v57 = vadd.f32 %v1634_v45, %v1477_v40  ;;  %v2137_v36 = vld [vmem:[%s2818_s20 + $0x6b8] sm:$0xff] }
  0xd6   : > { %v583_v58 = vpop.permute.xlu1 %582  ;;  %v578_v59 = vpop.permute.xlu0 %577  ;;  %v773_v63 = vmul.f32 %v573_v32, %v325_v41  ;;  %v774_v0 = vmul.f32 %v573_v32, %v326_v46  ;;  %v1480_v1 = vmul.f32 %v2128_v47, %v573_v32  ;;  %v1481_v2 = vmul.f32 %v2129_v48, %v573_v32  ;;  %v335_v41 = vld [vmem:[%s2818_s20 + $0x2c0] sm:$0xff]  ;;  %v336_v48 = vld [vmem:[%s2818_s20 + $0x2c8] sm:$0xff] }
  0xd7   : > { %v860_v4 = vadd.f32 %v859_v54, %v771_v49  ;;  %v929_v5 = vadd.f32 %v928_v55, %v772_v50  ;;  %v1567_v6 = vadd.f32 %v1566_v56, %v1478_v51  ;;  %v1636_v7 = vadd.f32 %v1635_v57, %v1479_v52  ;;  %v2138_v49 = vld [vmem:[%s2818_s20 + $0x6c0] sm:$0xff]  ;;  %v2139_v50 = vld [vmem:[%s2818_s20 + $0x6c8] sm:$0xff]  ;;  %v337_v55 = vld [vmem:[%s2818_s20 + $0x2d0] sm:$0xff] }
  0xd8   : > { %v775_v11 = vmul.f32 %v578_v59, %v327_v53  ;;  %v776_v12 = vmul.f32 %v578_v59, %v328_v60  ;;  %v1482_v13 = vmul.f32 %v2130_v61, %v578_v59  ;;  %v1483_v14 = vmul.f32 %v2131_v62, %v578_v59  ;;  %v338_v60 = vld [vmem:[%s2818_s20 + $0x2d8] sm:$0xff]  ;;  %v2140_v61 = vld [vmem:[%s2818_s20 + $0x6d0] sm:$0xff] }
  0xd9   : > { %v861_v16 = vadd.f32 %v860_v4, %v773_v63  ;;  %v930_v17 = vadd.f32 %v929_v5, %v774_v0  ;;  %v1568_v18 = vadd.f32 %v1567_v6, %v1480_v1  ;;  %v1637_v19 = vadd.f32 %v1636_v7, %v1481_v2  ;;  %v2141_v62 = vld [vmem:[%s2818_s20 + $0x6d8] sm:$0xff] }
  0xda   : > { %v593_v20 = vpop.permute.xlu1 %592  ;;  %v588_v21 = vpop.permute.xlu0 %587  ;;  %v777_v25 = vmul.f32 %v583_v58, %v329_v3  ;;  %v778_v26 = vmul.f32 %v583_v58, %v330_v8  ;;  %v1484_v27 = vmul.f32 %v2132_v9, %v583_v58  ;;  %v1485_v28 = vmul.f32 %v2133_v10, %v583_v58  ;;  %v339_v3 = vld [vmem:[%s2818_s20 + $0x2e0] sm:$0xff]  ;;  %v340_v10 = vld [vmem:[%s2818_s20 + $0x2e8] sm:$0xff] }
  0xdb   : > { %v862_v30 = vadd.f32 %v861_v16, %v775_v11  ;;  %v931_v31 = vadd.f32 %v930_v17, %v776_v12  ;;  %v1569_v32 = vadd.f32 %v1568_v18, %v1482_v13  ;;  %v1638_v33 = vadd.f32 %v1637_v19, %v1483_v14  ;;  %v2142_v11 = vld [vmem:[%s2818_s20 + $0x6e0] sm:$0xff]  ;;  %v2143_v12 = vld [vmem:[%s2818_s20 + $0x6e8] sm:$0xff]  ;;  %v341_v17 = vld [vmem:[%s2818_s20 + $0x2f0] sm:$0xff] }
  0xdc   : > { %v779_v37 = vmul.f32 %v588_v21, %v331_v15  ;;  %v780_v38 = vmul.f32 %v588_v21, %v332_v22  ;;  %v1486_v39 = vmul.f32 %v2134_v23, %v588_v21  ;;  %v1487_v40 = vmul.f32 %v2135_v24, %v588_v21  ;;  %v342_v22 = vld [vmem:[%s2818_s20 + $0x2f8] sm:$0xff]  ;;  %v2144_v23 = vld [vmem:[%s2818_s20 + $0x6f0] sm:$0xff] }
  0xdd   : > { %v863_v42 = vadd.f32 %v862_v30, %v777_v25  ;;  %v932_v43 = vadd.f32 %v931_v31, %v778_v26  ;;  %v1570_v44 = vadd.f32 %v1569_v32, %v1484_v27  ;;  %v1639_v45 = vadd.f32 %v1638_v33, %v1485_v28  ;;  %v2145_v24 = vld [vmem:[%s2818_s20 + $0x6f8] sm:$0xff] }
  0xde   : > { %v603_v46 = vpop.permute.xlu1 %602  ;;  %v598_v47 = vpop.permute.xlu0 %597  ;;  %v781_v51 = vmul.f32 %v593_v20, %v333_v29  ;;  %v782_v52 = vmul.f32 %v593_v20, %v334_v34  ;;  %v1488_v53 = vmul.f32 %v2136_v35, %v593_v20  ;;  %v1489_v54 = vmul.f32 %v2137_v36, %v593_v20  ;;  %v343_v29 = vld [vmem:[%s2818_s20 + $0x300] sm:$0xff]  ;;  %v344_v36 = vld [vmem:[%s2818_s20 + $0x308] sm:$0xff] }
  0xdf   : > { %v864_v56 = vadd.f32 %v863_v42, %v779_v37  ;;  %v933_v57 = vadd.f32 %v932_v43, %v780_v38  ;;  %v1571_v58 = vadd.f32 %v1570_v44, %v1486_v39  ;;  %v1640_v59 = vadd.f32 %v1639_v45, %v1487_v40  ;;  %v2146_v37 = vld [vmem:[%s2818_s20 + $0x700] sm:$0xff]  ;;  %v2147_v38 = vld [vmem:[%s2818_s20 + $0x708] sm:$0xff]  ;;  %v345_v43 = vld [vmem:[%s2818_s20 + $0x310] sm:$0xff] }
  0xe0   : > { %v783_v63 = vmul.f32 %v598_v47, %v335_v41  ;;  %v784_v0 = vmul.f32 %v598_v47, %v336_v48  ;;  %v1490_v1 = vmul.f32 %v2138_v49, %v598_v47  ;;  %v1491_v2 = vmul.f32 %v2139_v50, %v598_v47  ;;  %v346_v48 = vld [vmem:[%s2818_s20 + $0x318] sm:$0xff]  ;;  %v2148_v49 = vld [vmem:[%s2818_s20 + $0x710] sm:$0xff] }
  0xe1   : > { %v865_v4 = vadd.f32 %v864_v56, %v781_v51  ;;  %v934_v5 = vadd.f32 %v933_v57, %v782_v52  ;;  %v1572_v6 = vadd.f32 %v1571_v58, %v1488_v53  ;;  %v1641_v7 = vadd.f32 %v1640_v59, %v1489_v54  ;;  %v2149_v50 = vld [vmem:[%s2818_s20 + $0x718] sm:$0xff] }
  0xe2   : > { %v613_v8 = vpop.permute.xlu1 %612  ;;  %v608_v9 = vpop.permute.xlu0 %607  ;;  %v785_v13 = vmul.f32 %v603_v46, %v337_v55  ;;  %v786_v14 = vmul.f32 %v603_v46, %v338_v60  ;;  %v1492_v15 = vmul.f32 %v2140_v61, %v603_v46  ;;  %v1493_v16 = vmul.f32 %v2141_v62, %v603_v46  ;;  %v347_v55 = vld [vmem:[%s2818_s20 + $0x320] sm:$0xff]  ;;  %v348_v62 = vld [vmem:[%s2818_s20 + $0x328] sm:$0xff] }
  0xe3   : > { %v866_v18 = vadd.f32 %v865_v4, %v783_v63  ;;  %v935_v19 = vadd.f32 %v934_v5, %v784_v0  ;;  %v1573_v20 = vadd.f32 %v1572_v6, %v1490_v1  ;;  %v1642_v21 = vadd.f32 %v1641_v7, %v1491_v2  ;;  %v2150_v63 = vld [vmem:[%s2818_s20 + $0x720] sm:$0xff]  ;;  %v2151_v0 = vld [vmem:[%s2818_s20 + $0x728] sm:$0xff]  ;;  %v349_v5 = vld [vmem:[%s2818_s20 + $0x330] sm:$0xff] }
  0xe4   : > { %v787_v25 = vmul.f32 %v608_v9, %v339_v3  ;;  %v788_v26 = vmul.f32 %v608_v9, %v340_v10  ;;  %v1494_v27 = vmul.f32 %v2142_v11, %v608_v9  ;;  %v1495_v28 = vmul.f32 %v2143_v12, %v608_v9  ;;  %v350_v10 = vld [vmem:[%s2818_s20 + $0x338] sm:$0xff]  ;;  %v2152_v11 = vld [vmem:[%s2818_s20 + $0x730] sm:$0xff] }
  0xe5   : > { %v867_v30 = vadd.f32 %v866_v18, %v785_v13  ;;  %v936_v31 = vadd.f32 %v935_v19, %v786_v14  ;;  %v1574_v32 = vadd.f32 %v1573_v20, %v1492_v15  ;;  %v1643_v33 = vadd.f32 %v1642_v21, %v1493_v16  ;;  %v2153_v12 = vld [vmem:[%s2818_s20 + $0x738] sm:$0xff] }
  0xe6   : > { %v623_v34 = vpop.permute.xlu1 %622  ;;  %v618_v35 = vpop.permute.xlu0 %617  ;;  %v789_v39 = vmul.f32 %v613_v8, %v341_v17  ;;  %v790_v40 = vmul.f32 %v613_v8, %v342_v22  ;;  %v1496_v41 = vmul.f32 %v2144_v23, %v613_v8  ;;  %v1497_v42 = vmul.f32 %v2145_v24, %v613_v8  ;;  %v351_v17 = vld [vmem:[%s2818_s20 + $0x340] sm:$0xff]  ;;  %v352_v24 = vld [vmem:[%s2818_s20 + $0x348] sm:$0xff] }
  0xe7   : > { %v868_v44 = vadd.f32 %v867_v30, %v787_v25  ;;  %v937_v45 = vadd.f32 %v936_v31, %v788_v26  ;;  %v1575_v46 = vadd.f32 %v1574_v32, %v1494_v27  ;;  %v1644_v47 = vadd.f32 %v1643_v33, %v1495_v28  ;;  %v2154_v25 = vld [vmem:[%s2818_s20 + $0x740] sm:$0xff]  ;;  %v2155_v26 = vld [vmem:[%s2818_s20 + $0x748] sm:$0xff]  ;;  %v3033_v31 = vld [vmem:[%s2818_s20 + $0x350] sm:$0xff] }
  0xe8   : > { %v791_v51 = vmul.f32 %v618_v35, %v343_v29  ;;  %v792_v52 = vmul.f32 %v618_v35, %v344_v36  ;;  %v1498_v53 = vmul.f32 %v2146_v37, %v618_v35  ;;  %v1499_v54 = vmul.f32 %v2147_v38, %v618_v35  ;;  %v3036_v36 = vld [vmem:[%s2818_s20 + $0x358] sm:$0xff]  ;;  %v2156_v37 = vld [vmem:[%s2818_s20 + $0x750] sm:$0xff] }
  0xe9   : > { %v869_v56 = vadd.f32 %v868_v44, %v789_v39  ;;  %v938_v57 = vadd.f32 %v937_v45, %v790_v40  ;;  %v1576_v58 = vadd.f32 %v1575_v46, %v1496_v41  ;;  %v1645_v59 = vadd.f32 %v1644_v47, %v1497_v42  ;;  %v2157_v38 = vld [vmem:[%s2818_s20 + $0x758] sm:$0xff] }
  0xea   : > { %v633_v60 = vpop.permute.xlu1 %632  ;;  %v628_v61 = vpop.permute.xlu0 %627  ;;  %v793_v1 = vmul.f32 %v623_v34, %v345_v43  ;;  %v794_v2 = vmul.f32 %v623_v34, %v346_v48  ;;  %v1500_v3 = vmul.f32 %v2148_v49, %v623_v34  ;;  %v1501_v4 = vmul.f32 %v2149_v50, %v623_v34  ;;  %v3041_v43 = vld [vmem:[%s2818_s20 + $0x360] sm:$0xff]  ;;  %v3044_v50 = vld [vmem:[%s2818_s20 + $0x368] sm:$0xff] }
  0xeb   : > { %v870_v6 = vadd.f32 %v869_v56, %v791_v51  ;;  %v939_v7 = vadd.f32 %v938_v57, %v792_v52  ;;  %v1577_v8 = vadd.f32 %v1576_v58, %v1498_v53  ;;  %v1646_v9 = vadd.f32 %v1645_v59, %v1499_v54  ;;  %v2158_v51 = vld [vmem:[%s2818_s20 + $0x760] sm:$0xff]  ;;  %v2159_v52 = vld [vmem:[%s2818_s20 + $0x768] sm:$0xff]  ;;  %v3051_v57 = vld [vmem:[%s2818_s20 + $0x370] sm:$0xff] }
  0xec   : > { %v795_v13 = vmul.f32 %v628_v61, %v347_v55  ;;  %v796_v14 = vmul.f32 %v628_v61, %v348_v62  ;;  %v1502_v15 = vmul.f32 %v2150_v63, %v628_v61  ;;  %v1503_v16 = vmul.f32 %v2151_v0, %v628_v61  ;;  %v3054_v62 = vld [vmem:[%s2818_s20 + $0x378] sm:$0xff]  ;;  %v2160_v63 = vld [vmem:[%s2818_s20 + $0x770] sm:$0xff] }
  0xed   : > { %v871_v18 = vadd.f32 %v870_v6, %v793_v1  ;;  %v940_v19 = vadd.f32 %v939_v7, %v794_v2  ;;  %v1578_v20 = vadd.f32 %v1577_v8, %v1500_v3  ;;  %v1647_v21 = vadd.f32 %v1646_v9, %v1501_v4  ;;  %v2161_v0 = vld [vmem:[%s2818_s20 + $0x778] sm:$0xff] }
  0xee   : > { %v643_v22 = vpop.permute.xlu1 %642  ;;  %v638_v23 = vpop.permute.xlu0 %637  ;;  %v797_v27 = vmul.f32 %v633_v60, %v349_v5  ;;  %v798_v28 = vmul.f32 %v633_v60, %v350_v10  ;;  %v1504_v29 = vmul.f32 %v2152_v11, %v633_v60  ;;  %v1505_v30 = vmul.f32 %v2153_v12, %v633_v60  ;;  %v3061_v5 = vld [vmem:[%s2818_s20 + $0x380] sm:$0xff]  ;;  %v3064_v12 = vld [vmem:[%s2818_s20 + $0x388] sm:$0xff] }
  0xef   : > { %v872_v32 = vadd.f32 %v871_v18, %v795_v13  ;;  %v941_v33 = vadd.f32 %v940_v19, %v796_v14  ;;  %v1579_v34 = vadd.f32 %v1578_v20, %v1502_v15  ;;  %v1648_v35 = vadd.f32 %v1647_v21, %v1503_v16  ;;  %v2162_v13 = vld [vmem:[%s2818_s20 + $0x780] sm:$0xff]  ;;  %v2163_v14 = vld [vmem:[%s2818_s20 + $0x788] sm:$0xff]  ;;  %v3071_v19 = vld [vmem:[%s2818_s20 + $0x390] sm:$0xff] }
  0xf0   : > { %v799_v39 = vmul.f32 %v638_v23, %v351_v17  ;;  %v800_v40 = vmul.f32 %v638_v23, %v352_v24  ;;  %v1506_v41 = vmul.f32 %v2154_v25, %v638_v23  ;;  %v1507_v42 = vmul.f32 %v2155_v26, %v638_v23  ;;  %v3074_v24 = vld [vmem:[%s2818_s20 + $0x398] sm:$0xff]  ;;  %v2164_v25 = vld [vmem:[%s2818_s20 + $0x790] sm:$0xff] }
  0xf1   : > { %v873_v44 = vadd.f32 %v872_v32, %v797_v27  ;;  %v942_v45 = vadd.f32 %v941_v33, %v798_v28  ;;  %v1580_v46 = vadd.f32 %v1579_v34, %v1504_v29  ;;  %v1649_v47 = vadd.f32 %v1648_v35, %v1505_v30  ;;  %v2165_v26 = vld [vmem:[%s2818_s20 + $0x798] sm:$0xff]  ;;  %v3081_v32 = vld [vmem:[%s2818_s20 + $0x3a0] sm:$0xff] }
  0xf2   : > { %v653_v48 = vpop.permute.xlu1 %652  ;;  %v648_v49 = vpop.permute.xlu0 %647  ;;  %v801_v53 = vmul.f32 %v643_v22, %v3033_v31  ;;  %v802_v54 = vmul.f32 %v643_v22, %v3036_v36  ;;  %v1508_v55 = vmul.f32 %v2156_v37, %v643_v22  ;;  %v1509_v56 = vmul.f32 %v2157_v38, %v643_v22 }
  0xf3   : > { %v874_v58 = vadd.f32 %v873_v44, %v799_v39  ;;  %v943_v59 = vadd.f32 %v942_v45, %v800_v40  ;;  %v1581_v60 = vadd.f32 %v1580_v46, %v1506_v41  ;;  %v1650_v61 = vadd.f32 %v1649_v47, %v1507_v42  ;;  %v3084_v40 = vld [vmem:[%s2818_s20 + $0x3a8] sm:$0xff]  ;;  %v2166_v41 = vld [vmem:[%s2818_s20 + $0x7a0] sm:$0xff] }
  0xf4   : > { %v803_v1 = vmul.f32 %v648_v49, %v3041_v43  ;;  %v804_v2 = vmul.f32 %v648_v49, %v3044_v50  ;;  %v1510_v3 = vmul.f32 %v2158_v51, %v648_v49  ;;  %v1511_v4 = vmul.f32 %v2159_v52, %v648_v49  ;;  %v2167_v42 = vld [vmem:[%s2818_s20 + $0x7a8] sm:$0xff] }
  0xf5   : > { %v875_v6 = vadd.f32 %v874_v58, %v801_v53  ;;  %v944_v7 = vadd.f32 %v943_v59, %v802_v54  ;;  %v1582_v8 = vadd.f32 %v1581_v60, %v1508_v55  ;;  %v1651_v9 = vadd.f32 %v1650_v61, %v1509_v56  ;;  %v3094_v54 = vld [vmem:[%s2818_s20 + $0x3b8] sm:$0xff]  ;;  %v2168_v55 = vld [vmem:[%s2818_s20 + $0x7b0] sm:$0xff] }
  0xf6   : > { %v663_v10 = vpop.permute.xlu1 %662  ;;  %v658_v11 = vpop.permute.xlu0 %657  ;;  %v805_v15 = vmul.f32 %v653_v48, %v3051_v57  ;;  %v806_v16 = vmul.f32 %v653_v48, %v3054_v62  ;;  %v1512_v17 = vmul.f32 %v2160_v63, %v653_v48  ;;  %v1513_v18 = vmul.f32 %v2161_v0, %v653_v48  ;;  %v3091_v48 = vld [vmem:[%s2818_s20 + $0x3b0] sm:$0xff]  ;;  %v2169_v56 = vld [vmem:[%s2818_s20 + $0x7b8] sm:$0xff]  ;;  %v3101_v63 = vld [vmem:[%s2818_s20 + $0x3c0] sm:$0xff] }
  0xf7   : > { %v876_v20 = vadd.f32 %v875_v6, %v803_v1  ;;  %v945_v21 = vadd.f32 %v944_v7, %v804_v2  ;;  %v1583_v22 = vadd.f32 %v1582_v8, %v1510_v3  ;;  %v1652_v23 = vadd.f32 %v1651_v9, %v1511_v4  ;;  %v3104_v7 = vld [vmem:[%s2818_s20 + $0x3c8] sm:$0xff]  ;;  %v2170_v8 = vld [vmem:[%s2818_s20 + $0x7c0] sm:$0xff] }
  0xf8   : > { %v807_v27 = vmul.f32 %v658_v11, %v3061_v5  ;;  %v808_v28 = vmul.f32 %v658_v11, %v3064_v12  ;;  %v1514_v29 = vmul.f32 %v2162_v13, %v658_v11  ;;  %v1515_v30 = vmul.f32 %v2163_v14, %v658_v11  ;;  %v2171_v9 = vld [vmem:[%s2818_s20 + $0x7c8] sm:$0xff] }
  0xf9   : > { %v877_v33 = vadd.f32 %v876_v20, %v805_v15  ;;  %v946_v34 = vadd.f32 %v945_v21, %v806_v16  ;;  %v1584_v35 = vadd.f32 %v1583_v22, %v1512_v17  ;;  %v1653_v37 = vadd.f32 %v1652_v23, %v1513_v18  ;;  %v3111_v15 = vld [vmem:[%s2818_s20 + $0x3d0] sm:$0xff]  ;;  %v3114_v21 = vld [vmem:[%s2818_s20 + $0x3d8] sm:$0xff] }
  0xfa   : > { %v673_v38 = vpop.permute.xlu1 %672  ;;  %v668_v39 = vpop.permute.xlu0 %667  ;;  %v809_v44 = vmul.f32 %v663_v10, %v3071_v19  ;;  %v810_v45 = vmul.f32 %v663_v10, %v3074_v24  ;;  %v1516_v46 = vmul.f32 %v2164_v25, %v663_v10  ;;  %v1517_v47 = vmul.f32 %v2165_v26, %v663_v10  ;;  %v2172_v22 = vld [vmem:[%s2818_s20 + $0x7d0] sm:$0xff]  ;;  %v2173_v23 = vld [vmem:[%s2818_s20 + $0x7d8] sm:$0xff] }
  0xfb   : > { %v878_v49 = vadd.f32 %v877_v33, %v807_v27  ;;  %v947_v51 = vadd.f32 %v946_v34, %v808_v28  ;;  %v1585_v52 = vadd.f32 %v1584_v35, %v1514_v29  ;;  %v1654_v53 = vadd.f32 %v1653_v37, %v1515_v30  ;;  %v3121_v29 = vld [vmem:[%s2818_s20 + $0x3e0] sm:$0xff] }
  0xfc   : > { %v811_v58 = vmul.f32 %v668_v39, %v3081_v32  ;;  %v812_v59 = vmul.f32 %v668_v39, %v3084_v40  ;;  %v1518_v60 = vmul.f32 %v2166_v41, %v668_v39  ;;  %v1519_v61 = vmul.f32 %v2167_v42, %v668_v39  ;;  %v2174_v39 = vld [vmem:[%s2818_s20 + $0x7e0] sm:$0xff]  ;;  %v2175_v41 = vld [vmem:[%s2818_s20 + $0x7e8] sm:$0xff] }
  0xfd   : > { %v879_v0 = vadd.f32 %v878_v49, %v809_v44  ;;  %v948_v1 = vadd.f32 %v947_v51, %v810_v45  ;;  %v1586_v2 = vadd.f32 %v1585_v52, %v1516_v46  ;;  %v1655_v3 = vadd.f32 %v1654_v53, %v1517_v47  ;;  %v3131_v47 = vld [vmem:[%s2818_s20 + $0x3f0] sm:$0xff] }
  0xfe   : > { %v683_v4 = vpop.permute.xlu1 %682  ;;  %v678_v6 = vpop.permute.xlu0 %677  ;;  %v813_v10 = vmul.f32 %v673_v38, %v3091_v48  ;;  %v814_v11 = vmul.f32 %v673_v38, %v3094_v54  ;;  %v1520_v13 = vmul.f32 %v2168_v55, %v673_v38  ;;  %v1521_v14 = vmul.f32 %v2169_v56, %v673_v38  ;;  %v3124_v38 = vld [vmem:[%s2818_s20 + $0x3e8] sm:$0xff]  ;;  %v3134_v56 = vld [vmem:[%s2818_s20 + $0x3f8] sm:$0xff] }
  0xff   : > { %v880_v16 = vadd.f32 %v879_v0, %v811_v58  ;;  %v949_v17 = vadd.f32 %v948_v1, %v812_v59  ;;  %v1587_v18 = vadd.f32 %v1586_v2, %v1518_v60  ;;  %v1656_v20 = vadd.f32 %v1655_v3, %v1519_v61  ;;  %v2176_v58 = vld [vmem:[%s2818_s20 + $0x7f0] sm:$0xff]  ;;  %v2177_v59 = vld [vmem:[%s2818_s20 + $0x7f8] sm:$0xff] }
 0x100   : > { %v815_v25 = vmul.f32 %v678_v6, %v3101_v63  ;;  %v816_v26 = vmul.f32 %v678_v6, %v3104_v7  ;;  %v1522_v27 = vmul.f32 %v2170_v8, %v678_v6  ;;  %v1523_v28 = vmul.f32 %v2171_v9, %v678_v6 }
 0x101   : > { %v881_v30 = vadd.f32 %v880_v16, %v813_v10  ;;  %v950_v33 = vadd.f32 %v949_v17, %v814_v11  ;;  %v1588_v34 = vadd.f32 %v1587_v18, %v1520_v13  ;;  %v1657_v35 = vadd.f32 %v1656_v20, %v1521_v14 }
 0x102   : > { %v688_v37 = vpop.permute.xlu0 %687  ;;  %v817_v42 = vmul.f32 %v683_v4, %v3111_v15  ;;  %v818_v44 = vmul.f32 %v683_v4, %v3114_v21  ;;  %v1524_v45 = vmul.f32 %v2172_v22, %v683_v4  ;;  %v1525_v46 = vmul.f32 %v2173_v23, %v683_v4  ;;  %v693_v55 = vpop.permute.xlu1 %692 }
 0x103   : > { %v882_v49 = vadd.f32 %v881_v30, %v815_v25  ;;  %v951_v51 = vadd.f32 %v950_v33, %v816_v26  ;;  %v1589_v52 = vadd.f32 %v1588_v34, %v1522_v27  ;;  %v1658_v53 = vadd.f32 %v1657_v35, %v1523_v28 }
 0x104   : > { %v819_v60 = vmul.f32 %v688_v37, %v3121_v29  ;;  %v820_v61 = vmul.f32 %v688_v37, %v3124_v38  ;;  %v1526_v0 = vmul.f32 %v2174_v39, %v688_v37  ;;  %v1527_v1 = vmul.f32 %v2175_v41, %v688_v37 }
 0x105   : > { %v883_v2 = vadd.f32 %v882_v49, %v817_v42  ;;  %v952_v3 = vadd.f32 %v951_v51, %v818_v44  ;;  %v1590_v4 = vadd.f32 %v1589_v52, %v1524_v45  ;;  %v1659_v6 = vadd.f32 %v1658_v53, %v1525_v46  ;;  %v181_v51 = vld [vmem:[%s3948_s0 + $0x10] sm:$0xff] }
 0x106   : > { %v821_v8 = vmul.f32 %v693_v55, %v3131_v47  ;;  %v822_v9 = vmul.f32 %v693_v55, %v3134_v56  ;;  %v1528_v10 = vmul.f32 %v2176_v58, %v693_v55  ;;  %v1529_v11 = vmul.f32 %v2177_v59, %v693_v55  ;;  %v182_v59 = vld [vmem:[%s3948_s0 + $0x18] sm:$0xff] }
 0x107   : > { %v884_v13 = vadd.f32 %v883_v2, %v819_v60  ;;  %v953_v14 = vadd.f32 %v952_v3, %v820_v61  ;;  %v1591_v16 = vadd.f32 %v1590_v4, %v1526_v0  ;;  %v1660_v17 = vadd.f32 %v1659_v6, %v1527_v1  ;;  %v179_v60 = vld [vmem:[%s3948_s0] sm:$0xff]  ;;  %v180_v61 = vld [vmem:[%s3948_s0 + $0x8] sm:$0xff] }
 0x109   : > { %v885_v18 = vadd.f32 %v884_v13, %v821_v8  ;;  %v954_v20 = vadd.f32 %v953_v14, %v822_v9  ;;  %v1592_v22 = vadd.f32 %v1591_v16, %v1528_v10  ;;  %v1661_v23 = vadd.f32 %v1660_v17, %v1529_v11 }
 0x10b   : > { %v886_v25 = vrot.slane %v885_v18, 4  ;;  %v955_v26 = vrot.slane %v954_v20, 4  ;;  %v1593_v27 = vrot.slane %v1592_v22, 4  ;;  %v1662_v28 = vrot.slane %v1661_v23, 4 }
 0x10d   : > { %v887_v30 = vadd.f32 %v886_v25, %v885_v18  ;;  %v956_v33 = vadd.f32 %v955_v26, %v954_v20  ;;  %v1594_v34 = vadd.f32 %v1593_v27, %v1592_v22  ;;  %v1663_v35 = vadd.f32 %v1662_v28, %v1661_v23 }
 0x10f   : > { %v888_v37 = vrot.slane %v887_v30, 2  ;;  %v957_v39 = vrot.slane %v956_v33, 2  ;;  %v1595_v41 = vrot.slane %v1594_v34, 2  ;;  %v1664_v42 = vrot.slane %v1663_v35, 2 }
 0x111   : > { %v889_v44 = vadd.f32 %v888_v37, %v887_v30  ;;  %v958_v45 = vadd.f32 %v957_v39, %v956_v33  ;;  %v1596_v46 = vadd.f32 %v1595_v41, %v1594_v34  ;;  %v1665_v49 = vadd.f32 %v1664_v42, %v1663_v35 }
 0x113   : > { %v890_v52 = vrot.slane %v889_v44, 1  ;;  %v959_v53 = vrot.slane %v958_v45, 1  ;;  %v1597_v55 = vrot.slane %v1596_v46, 1  ;;  %v1666_v58 = vrot.slane %v1665_v49, 1 }
 0x115   : > { %v891_v0 = vadd.f32 %v890_v52, %v889_v44  ;;  %v960_v1 = vadd.f32 %v959_v53, %v958_v45  ;;  %v1598_v2 = vadd.f32 %v1597_v55, %v1596_v46  ;;  %v1667_v3 = vadd.f32 %v1666_v58, %v1665_v49 }
 0x117   : > { %v963_v4 = vadd.f32 %v891_v0, %v181_v51  ;;  %v964_v6 = vadd.f32 %v960_v1, %v182_v59  ;;  %v961_v8 = vadd.f32 %v891_v0, %v179_v60  ;;  %v962_v9 = vadd.f32 %v960_v1, %v180_v61 }
 0x118   : > { %v1668_v13 = vadd.f32 %v1598_v2, %v179_v60  ;;  %v1669_v14 = vadd.f32 %v1667_v3, %v180_v61  ;;  %v1670_v17 = vadd.f32 %v1598_v2, %v181_v51  ;;  %v1671_v18 = vadd.f32 %v1667_v3, %v182_v59 }
 0x119   : > { %v968_v10 = vmax.f32 %v963_v4, %v964_v6  ;;  %v965_v11 = vmax.f32 %v961_v8, %v962_v9 }
 0x11a   : > { %v1672_v16 = vmax.f32 %v1668_v13, %v1669_v14  ;;  %v1675_v20 = vmax.f32 %v1670_v17, %v1671_v18 }
 0x11b   : > { %969 = vmax.xlane.f32.xlu1 %v968_v10  ;;  %966 = vmax.xlane.f32.xlu0 %v965_v11 }
 0x11f   : > { %1673 = vmax.xlane.f32.xlu0 %v1672_v16 }
 0x123   : > { %1676 = vmax.xlane.f32.xlu0 %v1675_v20 }
 0x1a8   : > { %v970_v22 = vpop.xlane.xlu1 %969  ;;  %v967_v23 = vpop.xlane.xlu0 %966 }
 0x1a9   : > { %v973_v25 = vsub.f32 %v963_v4, %v970_v22  ;;  %v974_v26 = vsub.f32 %v964_v6, %v970_v22  ;;  %v971_v27 = vsub.f32 %v961_v8, %v967_v23  ;;  %v972_v28 = vsub.f32 %v962_v9, %v967_v23 }
 0x1ab   : > { %v979_v30 = vmul.f32 1.442695, %v973_v25  ;;  %v981_v33 = vmul.f32 1.442695, %v974_v26  ;;  %v975_v34 = vmul.f32 1.442695, %v971_v27 }
 0x1ac   : > { %v977_v35 = vmul.f32 1.442695, %v972_v28  ;;  %v1674_v37 = vpop.xlane.xlu0 %1673 }
 0x1ad   : > { %2321 = vpow2.f32 %v979_v30  ;;  %v1678_v39 = vsub.f32 %v1668_v13, %v1674_v37  ;;  %v1679_v41 = vsub.f32 %v1669_v14, %v1674_v37 }
 0x1ae   : > { %2323 = vpow2.f32 %v981_v33 }
 0x1af   : > { %2325 = vpow2.f32 %v975_v34  ;;  %v1682_v42 = vmul.f32 1.442695, %v1678_v39  ;;  %v1684_v44 = vmul.f32 1.442695, %v1679_v41 }
 0x1b0   : > { %2327 = vpow2.f32 %v977_v35  ;;  %v1677_v45 = vpop.xlane.xlu0 %1676 }
 0x1b1   : > { %2329 = vpow2.f32 %v1682_v42  ;;  %v1680_v46 = vsub.f32 %v1670_v17, %v1677_v45  ;;  %v1681_v49 = vsub.f32 %v1671_v18, %v1677_v45 }
 0x1b2   : > { %2331 = vpow2.f32 %v1684_v44 }
 0x1b3   : > { %v1686_v51 = vmul.f32 1.442695, %v1680_v46  ;;  %v1688_v52 = vmul.f32 1.442695, %v1681_v49 }
 0x1b5   : > { %2333 = vpow2.f32 %v1686_v51 }
 0x1b6   : > { %2335 = vpow2.f32 %v1688_v52 }
 0x1b7   : > { %v2322_v53 = vpop.eup %2321 }
 0x1b8   : > { %v2324_v55 = vpop.eup %2323 }
 0x1b9   : > { %v2326_v58 = vpop.eup %2325  ;;  %v986_v59 = vadd.f32 %v2324_v55, %v2322_v53 }
 0x1ba   : > { %v2328_v60 = vpop.eup %2327 }
 0x1bb   : > { %v2330_v61 = vpop.eup %2329  ;;  %987 = vadd.xlane.f32.xlu0 %v986_v59  ;;  %v983_v0 = vadd.f32 %v2328_v60, %v2326_v58 }
 0x1bc   : > { %v2332_v1 = vpop.eup %2331 }
 0x1bd   : > { %984 = vadd.xlane.f32.xlu1 %v983_v0  ;;  %v1690_v2 = vadd.f32 %v2332_v1, %v2330_v61 }
 0x1bf   : > { %v2334_v3 = vpop.eup %2333 }
 0x1c0   : > { %v2336_v4 = vpop.eup %2335 }
 0x1c1   : > { %1691 = vadd.xlane.f32.xlu1 %v1690_v2  ;;  %v1693_v6 = vadd.f32 %v2336_v4, %v2334_v3 }
 0x1c3   : > { %1694 = vadd.xlane.f32.xlu0 %v1693_v6 }
 0x248   : > { %v988_v8 = vpop.xlane.xlu0 %987 }
 0x249   : > { %2337 = vrcp.f32 %v988_v8 }
 0x24a   : > { %v985_v9 = vpop.xlane.xlu1 %984 }
 0x24b   : > { %2339 = vrcp.f32 %v985_v9 }
 0x24e   : > { %v1692_v10 = vpop.xlane.xlu1 %1691 }
 0x24f   : > { %2341 = vrcp.f32 %v1692_v10 }
 0x250   : > { %v1695_v11 = vpop.xlane.xlu0 %1694 }
 0x251   : > { %2343 = vrcp.f32 %v1695_v11 }
 0x253   : > { %v2338_v13 = vpop.eup %2337 }
 0x254   : > { %v992_v14 = vmul.f32 %v2338_v13, %v988_v8 }
 0x255   : > { %v2340_v16 = vpop.eup %2339 }
 0x256   : > { %v991_v17 = vmul.f32 %v2340_v16, %v985_v9  ;;  %v994_v18 = vsub.f32 2.0, %v992_v14 }
 0x258   : > { %v993_v20 = vsub.f32 2.0, %v991_v17  ;;  %v996_v22 = vmul.f32 %v2338_v13, %v994_v18 }
 0x259   : > { %v2342_v23 = vpop.eup %2341 }
 0x25a   : > { %v995_v25 = vmul.f32 %v2340_v16, %v993_v20  ;;  %v999_v26 = vmul.f32 %v2322_v53, %v996_v22  ;;  %v1000_v27 = vmul.f32 %v2324_v55, %v996_v22  ;;  %v1698_v28 = vmul.f32 %v2342_v23, %v1692_v10 }
 0x25b   : > { %v2344_v30 = vpop.eup %2343 }
 0x25c   : > { %v997_v33 = vmul.f32 %v2326_v58, %v995_v25  ;;  %v998_v34 = vmul.f32 %v2328_v60, %v995_v25  ;;  %v1700_v35 = vsub.f32 2.0, %v1698_v28  ;;  %v1699_v37 = vmul.f32 %v2344_v30, %v1695_v11  ;;  %v2345_v25 = vld [vmem:[%s2818_s20] sm:$0xff] }
 0x25e   : > { %v1001_v39 = vadd.f32 %v999_v26, %v997_v33  ;;  %v1008_v41 = vadd.f32 %v1000_v27, %v998_v34  ;;  %v1701_v42 = vsub.f32 2.0, %v1699_v37  ;;  %v1702_v44 = vmul.f32 %v2342_v23, %v1700_v35  ;;  %v2346_v27 = vld [vmem:[%s2818_s20 + $0x8] sm:$0xff]  ;;  %v2348_v34 = vld [vmem:[%s2818_s20 + $0x18] sm:$0xff]  ;;  %v2349_v37 = vld [vmem:[%s2818_s20 + $0x20] sm:$0xff] }
 0x260   : > { %v1002_v45 = vrot.slane %v1001_v39, 4  ;;  %v1009_v46 = vrot.slane %v1008_v41, 4  ;;  %v1703_v49 = vmul.f32 %v2344_v30, %v1701_v42  ;;  %v1704_v59 = vmul.f32 %v2330_v61, %v1702_v44  ;;  %v2347_v30 = vld [vmem:[%s2818_s20 + $0x10] sm:$0xff] }
 0x261   : > { %v1705_v0 = vmul.f32 %v2332_v1, %v1702_v44  ;;  %v2351_v44 = vld [vmem:[%s2818_s20 + $0x30] sm:$0xff] }
 0x262   : > { %v1003_v51 = vadd.f32 %v1002_v45, %v1001_v39  ;;  %v1010_v52 = vadd.f32 %v1009_v46, %v1008_v41  ;;  %v1706_v2 = vmul.f32 %v2334_v3, %v1703_v49  ;;  %v1707_v53 = vmul.f32 %v2336_v4, %v1703_v49  ;;  %v2350_v41 = vld [vmem:[%s2818_s20 + $0x28] sm:$0xff]  ;;  %v2352_v46 = vld [vmem:[%s2818_s20 + $0x38] sm:$0xff] }
 0x264   : > { %v1004_v55 = vrot.slane %v1003_v51, 2  ;;  %v1011_v6 = vrot.slane %v1010_v52, 2  ;;  %v1708_v8 = vadd.f32 %v1706_v2, %v1704_v59  ;;  %v1715_v58 = vadd.f32 %v1707_v53, %v1705_v0  ;;  %v2354_v59 = vld [vmem:[%s2818_s20 + $0x48] sm:$0xff]  ;;  %v2355_v2 = vld [vmem:[%s2818_s20 + $0x50] sm:$0xff] }
 0x266   : > { %v1005_v60 = vadd.f32 %v1004_v55, %v1003_v51  ;;  %v1012_v9 = vadd.f32 %v1011_v6, %v1010_v52  ;;  %v1709_v10 = vrot.slane %v1708_v8, 4  ;;  %v1716_v11 = vrot.slane %v1715_v58, 4  ;;  %v2353_v51 = vld [vmem:[%s2818_s20 + $0x40] sm:$0xff]  ;;  %v2356_v55 = vld [vmem:[%s2818_s20 + $0x58] sm:$0xff] }
 0x268   : > { %v1006_v13 = vrot.slane %v1005_v60, 1  ;;  %v1013_v14 = vrot.slane %v1012_v9, 1  ;;  %v1710_v16 = vadd.f32 %v1709_v10, %v1708_v8  ;;  %v1717_v17 = vadd.f32 %v1716_v11, %v1715_v58  ;;  %v2357_v8 = vld [vmem:[%s2818_s20 + $0x60] sm:$0xff]  ;;  %v2359_v10 = vld [vmem:[%s2818_s20 + $0x70] sm:$0xff] }
 0x26a   : > { %v1007_v61 = vadd.f32 %v1006_v13, %v1005_v60  ;;  %v1014_v1 = vadd.f32 %v1013_v14, %v1012_v9  ;;  %v1711_v3 = vrot.slane %v1710_v16, 2  ;;  %v1718_v4 = vrot.slane %v1717_v17, 2  ;;  %v2358_v60 = vld [vmem:[%s2818_s20 + $0x68] sm:$0xff]  ;;  %v2360_v13 = vld [vmem:[%s2818_s20 + $0x78] sm:$0xff] }
 0x26c   : > { %v3154_v18 = vadd.f32 1.0, %v1007_v61  ;;  %v3156_v20 = vadd.f32 1.0, %v1014_v1  ;;  %v3165_v22 = vadd.f32 %v1711_v3, %v1710_v16  ;;  %v3167_v23 = vadd.f32 %v1718_v4, %v1717_v17  ;;  %v2361_v16 = vld [vmem:[%s2818_s20 + $0x80] sm:$0xff]  ;;  %v2362_v61 = vld [vmem:[%s2818_s20 + $0x88] sm:$0xff]  ;;  %v2363_v3 = vld [vmem:[%s2818_s20 + $0x90] sm:$0xff] }
 0x26e   : > { %v1017_v26 = vmul.f32 %v2345_v25, %v3154_v18  ;;  %v1018_v28 = vmul.f32 %v2346_v27, %v3156_v20  ;;  %v1019_v33 = vmul.f32 %v2347_v30, %v3154_v18  ;;  %v1020_v35 = vmul.f32 %v2348_v34, %v3156_v20  ;;  %v2364_v25 = vld [vmem:[%s2818_s20 + $0x98] sm:$0xff]  ;;  %v2365_v27 = vld [vmem:[%s2818_s20 + $0xa0] sm:$0xff]  ;;  %v2366_v30 = vld [vmem:[%s2818_s20 + $0xa8] sm:$0xff] }
 0x26f   : > { %v1021_v39 = vmul.f32 %v2349_v37, %v3154_v18  ;;  %v1022_v42 = vmul.f32 %v2350_v41, %v3156_v20  ;;  %v1023_v45 = vmul.f32 %v2351_v44, %v3154_v18  ;;  %v1024_v49 = vmul.f32 %v2352_v46, %v3156_v20  ;;  %v2367_v34 = vld [vmem:[%s2818_s20 + $0xb0] sm:$0xff]  ;;  %v2368_v37 = vld [vmem:[%s2818_s20 + $0xb8] sm:$0xff]  ;;  %v2369_v41 = vld [vmem:[%s2818_s20 + $0xc0] sm:$0xff] }
 0x270   : > { %v1025_v52 = vmul.f32 %v2353_v51, %v3154_v18  ;;  %v1026_v0 = vmul.f32 %v2354_v59, %v3156_v20  ;;  %v1027_v53 = vmul.f32 %v2355_v2, %v3154_v18  ;;  %v1028_v6 = vmul.f32 %v2356_v55, %v3156_v20  ;;  %1145 = vst [vmem:[%s3163_s5] sm:$0xff] %v1017_v26  ;;  %v2370_v44 = vld [vmem:[%s2818_s20 + $0xc8] sm:$0xff]  ;;  %v2371_v46 = vld [vmem:[%s2818_s20 + $0xd0] sm:$0xff]  ;;  %v2372_v51 = vld [vmem:[%s2818_s20 + $0xd8] sm:$0xff] }
 0x271   : > { %1146 = vst [vmem:[%s3163_s5 + $0x8] sm:$0xff] %v1018_v28  ;;  %1147 = vst [vmem:[%s3163_s5 + $0x10] sm:$0xff] %v1019_v33  ;;  %v1029_v58 = vmul.f32 %v2357_v8, %v3154_v18  ;;  %v1030_v9 = vmul.f32 %v2358_v60, %v3156_v20  ;;  %v1031_v11 = vmul.f32 %v2359_v10, %v3154_v18  ;;  %v2373_v59 = vld [vmem:[%s2818_s20 + $0xe0] sm:$0xff]  ;;  %v2374_v2 = vld [vmem:[%s2818_s20 + $0xe8] sm:$0xff] }
 0x272   : > { %1148 = vst [vmem:[%s3163_s5 + $0x18] sm:$0xff] %v1020_v35  ;;  %v1032_v14 = vmul.f32 %v2360_v13, %v3156_v20  ;;  %1149 = vst [vmem:[%s3163_s5 + $0x20] sm:$0xff] %v1021_v39  ;;  %v1033_v17 = vmul.f32 %v2361_v16, %v3154_v18  ;;  %v1034_v1 = vmul.f32 %v2362_v61, %v3156_v20  ;;  %v2375_v55 = vld [vmem:[%s2818_s20 + $0xf0] sm:$0xff]  ;;  %v2376_v8 = vld [vmem:[%s2818_s20 + $0xf8] sm:$0xff] }
 0x273   : > { %1150 = vst [vmem:[%s3163_s5 + $0x28] sm:$0xff] %v1022_v42  ;;  %1151 = vst [vmem:[%s3163_s5 + $0x30] sm:$0xff] %v1023_v45  ;;  %v1035_v4 = vmul.f32 %v2363_v3, %v3154_v18  ;;  %v1036_v26 = vmul.f32 %v2364_v25, %v3156_v20  ;;  %v1037_v28 = vmul.f32 %v2365_v27, %v3154_v18  ;;  %v2377_v60 = vld [vmem:[%s2818_s20 + $0x100] sm:$0xff]  ;;  %v2378_v10 = vld [vmem:[%s2818_s20 + $0x108] sm:$0xff] }
 0x274   : > { %1152 = vst [vmem:[%s3163_s5 + $0x38] sm:$0xff] %v1024_v49  ;;  %1153 = vst [vmem:[%s3163_s5 + $0x40] sm:$0xff] %v1025_v52  ;;  %v1038_v33 = vmul.f32 %v2366_v30, %v3156_v20  ;;  %v1039_v35 = vmul.f32 %v2367_v34, %v3154_v18  ;;  %v1040_v39 = vmul.f32 %v2368_v37, %v3156_v20  ;;  %v2379_v13 = vld [vmem:[%s2818_s20 + $0x110] sm:$0xff]  ;;  %v2380_v16 = vld [vmem:[%s2818_s20 + $0x118] sm:$0xff] }
 0x275   : > { %1154 = vst [vmem:[%s3163_s5 + $0x48] sm:$0xff] %v1026_v0  ;;  %1155 = vst [vmem:[%s3163_s5 + $0x50] sm:$0xff] %v1027_v53  ;;  %v1041_v42 = vmul.f32 %v2369_v41, %v3154_v18  ;;  %v1042_v45 = vmul.f32 %v2370_v44, %v3156_v20  ;;  %v1043_v49 = vmul.f32 %v2371_v46, %v3154_v18  ;;  %v2381_v61 = vld [vmem:[%s2818_s20 + $0x120] sm:$0xff]  ;;  %v2382_v3 = vld [vmem:[%s2818_s20 + $0x128] sm:$0xff] }
 0x276   : > { %1156 = vst [vmem:[%s3163_s5 + $0x58] sm:$0xff] %v1028_v6  ;;  %1157 = vst [vmem:[%s3163_s5 + $0x60] sm:$0xff] %v1029_v58  ;;  %v1044_v52 = vmul.f32 %v2372_v51, %v3156_v20  ;;  %v1045_v0 = vmul.f32 %v2373_v59, %v3154_v18  ;;  %v1046_v53 = vmul.f32 %v2374_v2, %v3156_v20  ;;  %v2383_v25 = vld [vmem:[%s2818_s20 + $0x130] sm:$0xff]  ;;  %v2384_v27 = vld [vmem:[%s2818_s20 + $0x138] sm:$0xff] }
 0x277   : > { %1158 = vst [vmem:[%s3163_s5 + $0x68] sm:$0xff] %v1030_v9  ;;  %1159 = vst [vmem:[%s3163_s5 + $0x70] sm:$0xff] %v1031_v11  ;;  %v1047_v6 = vmul.f32 %v2375_v55, %v3154_v18  ;;  %v1048_v58 = vmul.f32 %v2376_v8, %v3156_v20  ;;  %v1049_v9 = vmul.f32 %v2377_v60, %v3154_v18  ;;  %v2385_v30 = vld [vmem:[%s2818_s20 + $0x140] sm:$0xff]  ;;  %v2386_v34 = vld [vmem:[%s2818_s20 + $0x148] sm:$0xff] }
 0x278   : > { %1160 = vst [vmem:[%s3163_s5 + $0x78] sm:$0xff] %v1032_v14  ;;  %1161 = vst [vmem:[%s3163_s5 + $0x80] sm:$0xff] %v1033_v17  ;;  %v1050_v11 = vmul.f32 %v2378_v10, %v3156_v20  ;;  %v1051_v14 = vmul.f32 %v2379_v13, %v3154_v18  ;;  %v1052_v17 = vmul.f32 %v2380_v16, %v3156_v20  ;;  %v2387_v37 = vld [vmem:[%s2818_s20 + $0x150] sm:$0xff]  ;;  %v2388_v41 = vld [vmem:[%s2818_s20 + $0x158] sm:$0xff] }
 0x279   : > { %1162 = vst [vmem:[%s3163_s5 + $0x88] sm:$0xff] %v1034_v1  ;;  %1163 = vst [vmem:[%s3163_s5 + $0x90] sm:$0xff] %v1035_v4  ;;  %v1053_v1 = vmul.f32 %v2381_v61, %v3154_v18  ;;  %v1054_v4 = vmul.f32 %v2382_v3, %v3156_v20  ;;  %v2389_v44 = vld [vmem:[%s2818_s20 + $0x160] sm:$0xff]  ;;  %v2390_v46 = vld [vmem:[%s2818_s20 + $0x168] sm:$0xff] }
 0x27a   : > { %1164 = vst [vmem:[%s3163_s5 + $0x98] sm:$0xff] %v1036_v26  ;;  %1165 = vst [vmem:[%s3163_s5 + $0xa0] sm:$0xff] %v1037_v28  ;;  %v1055_v26 = vmul.f32 %v2383_v25, %v3154_v18  ;;  %v1056_v28 = vmul.f32 %v2384_v27, %v3156_v20  ;;  %v2391_v51 = vld [vmem:[%s2818_s20 + $0x170] sm:$0xff]  ;;  %v2392_v59 = vld [vmem:[%s2818_s20 + $0x178] sm:$0xff] }
 0x27b   : > { %1166 = vst [vmem:[%s3163_s5 + $0xa8] sm:$0xff] %v1038_v33  ;;  %1167 = vst [vmem:[%s3163_s5 + $0xb0] sm:$0xff] %v1039_v35  ;;  %v1057_v33 = vmul.f32 %v2385_v30, %v3154_v18  ;;  %v1058_v35 = vmul.f32 %v2386_v34, %v3156_v20  ;;  %v2393_v2 = vld [vmem:[%s2818_s20 + $0x180] sm:$0xff]  ;;  %v2394_v55 = vld [vmem:[%s2818_s20 + $0x188] sm:$0xff] }
 0x27c   : > { %1168 = vst [vmem:[%s3163_s5 + $0xb8] sm:$0xff] %v1040_v39  ;;  %1169 = vst [vmem:[%s3163_s5 + $0xc0] sm:$0xff] %v1041_v42  ;;  %v1059_v39 = vmul.f32 %v2387_v37, %v3154_v18  ;;  %v1060_v42 = vmul.f32 %v2388_v41, %v3156_v20  ;;  %v2395_v8 = vld [vmem:[%s2818_s20 + $0x190] sm:$0xff]  ;;  %v2396_v60 = vld [vmem:[%s2818_s20 + $0x198] sm:$0xff] }
 0x27d   : > { %1170 = vst [vmem:[%s3163_s5 + $0xc8] sm:$0xff] %v1042_v45  ;;  %1171 = vst [vmem:[%s3163_s5 + $0xd0] sm:$0xff] %v1043_v49  ;;  %v1061_v45 = vmul.f32 %v2389_v44, %v3154_v18  ;;  %v1062_v49 = vmul.f32 %v2390_v46, %v3156_v20  ;;  %v2397_v10 = vld [vmem:[%s2818_s20 + $0x1a0] sm:$0xff]  ;;  %v2398_v13 = vld [vmem:[%s2818_s20 + $0x1a8] sm:$0xff] }
 0x27e   : > { %1172 = vst [vmem:[%s3163_s5 + $0xd8] sm:$0xff] %v1044_v52  ;;  %1173 = vst [vmem:[%s3163_s5 + $0xe0] sm:$0xff] %v1045_v0  ;;  %v1063_v52 = vmul.f32 %v2391_v51, %v3154_v18  ;;  %v1064_v0 = vmul.f32 %v2392_v59, %v3156_v20  ;;  %v2399_v16 = vld [vmem:[%s2818_s20 + $0x1b0] sm:$0xff]  ;;  %v2400_v61 = vld [vmem:[%s2818_s20 + $0x1b8] sm:$0xff] }
 0x27f   : > { %1174 = vst [vmem:[%s3163_s5 + $0xe8] sm:$0xff] %v1046_v53  ;;  %1175 = vst [vmem:[%s3163_s5 + $0xf0] sm:$0xff] %v1047_v6  ;;  %v1065_v53 = vmul.f32 %v2393_v2, %v3154_v18  ;;  %v1066_v6 = vmul.f32 %v2394_v55, %v3156_v20  ;;  %v2401_v3 = vld [vmem:[%s2818_s20 + $0x1c0] sm:$0xff]  ;;  %v2402_v25 = vld [vmem:[%s2818_s20 + $0x1c8] sm:$0xff] }
 0x280   : > { %1176 = vst [vmem:[%s3163_s5 + $0xf8] sm:$0xff] %v1048_v58  ;;  %1177 = vst [vmem:[%s3163_s5 + $0x100] sm:$0xff] %v1049_v9  ;;  %v1067_v58 = vmul.f32 %v2395_v8, %v3154_v18  ;;  %v1068_v9 = vmul.f32 %v2396_v60, %v3156_v20  ;;  %v2403_v27 = vld [vmem:[%s2818_s20 + $0x1d0] sm:$0xff]  ;;  %v2404_v30 = vld [vmem:[%s2818_s20 + $0x1d8] sm:$0xff] }
 0x281   : > { %1178 = vst [vmem:[%s3163_s5 + $0x108] sm:$0xff] %v1050_v11  ;;  %1179 = vst [vmem:[%s3163_s5 + $0x110] sm:$0xff] %v1051_v14  ;;  %v1069_v11 = vmul.f32 %v2397_v10, %v3154_v18  ;;  %v1070_v14 = vmul.f32 %v2398_v13, %v3156_v20  ;;  %v2405_v34 = vld [vmem:[%s2818_s20 + $0x1e0] sm:$0xff]  ;;  %v2406_v37 = vld [vmem:[%s2818_s20 + $0x1e8] sm:$0xff] }
 0x282   : > { %1180 = vst [vmem:[%s3163_s5 + $0x118] sm:$0xff] %v1052_v17  ;;  %1181 = vst [vmem:[%s3163_s5 + $0x120] sm:$0xff] %v1053_v1  ;;  %v1071_v17 = vmul.f32 %v2399_v16, %v3154_v18  ;;  %v1072_v1 = vmul.f32 %v2400_v61, %v3156_v20  ;;  %v2407_v41 = vld [vmem:[%s2818_s20 + $0x1f0] sm:$0xff]  ;;  %v2408_v44 = vld [vmem:[%s2818_s20 + $0x1f8] sm:$0xff] }
 0x283   : > { %1182 = vst [vmem:[%s3163_s5 + $0x128] sm:$0xff] %v1054_v4  ;;  %1183 = vst [vmem:[%s3163_s5 + $0x130] sm:$0xff] %v1055_v26  ;;  %v1073_v4 = vmul.f32 %v2401_v3, %v3154_v18  ;;  %v1074_v26 = vmul.f32 %v2402_v25, %v3156_v20  ;;  %v2409_v46 = vld [vmem:[%s2818_s20 + $0x200] sm:$0xff]  ;;  %v2410_v51 = vld [vmem:[%s2818_s20 + $0x208] sm:$0xff] }
 0x284   : > { %1184 = vst [vmem:[%s3163_s5 + $0x138] sm:$0xff] %v1056_v28  ;;  %1185 = vst [vmem:[%s3163_s5 + $0x140] sm:$0xff] %v1057_v33  ;;  %v1075_v28 = vmul.f32 %v2403_v27, %v3154_v18  ;;  %v1076_v33 = vmul.f32 %v2404_v30, %v3156_v20  ;;  %v2411_v59 = vld [vmem:[%s2818_s20 + $0x210] sm:$0xff]  ;;  %v2412_v2 = vld [vmem:[%s2818_s20 + $0x218] sm:$0xff] }
 0x285   : > { %1186 = vst [vmem:[%s3163_s5 + $0x148] sm:$0xff] %v1058_v35  ;;  %1187 = vst [vmem:[%s3163_s5 + $0x150] sm:$0xff] %v1059_v39  ;;  %v1077_v35 = vmul.f32 %v2405_v34, %v3154_v18  ;;  %v1078_v39 = vmul.f32 %v2406_v37, %v3156_v20  ;;  %v2413_v55 = vld [vmem:[%s2818_s20 + $0x220] sm:$0xff]  ;;  %v2414_v8 = vld [vmem:[%s2818_s20 + $0x228] sm:$0xff] }
 0x286   : > { %1188 = vst [vmem:[%s3163_s5 + $0x158] sm:$0xff] %v1060_v42  ;;  %1189 = vst [vmem:[%s3163_s5 + $0x160] sm:$0xff] %v1061_v45  ;;  %v1079_v42 = vmul.f32 %v2407_v41, %v3154_v18  ;;  %v1080_v45 = vmul.f32 %v2408_v44, %v3156_v20  ;;  %v2415_v60 = vld [vmem:[%s2818_s20 + $0x230] sm:$0xff]  ;;  %v2416_v10 = vld [vmem:[%s2818_s20 + $0x238] sm:$0xff] }
 0x287   : > { %1190 = vst [vmem:[%s3163_s5 + $0x168] sm:$0xff] %v1062_v49  ;;  %1191 = vst [vmem:[%s3163_s5 + $0x170] sm:$0xff] %v1063_v52  ;;  %v1081_v49 = vmul.f32 %v2409_v46, %v3154_v18  ;;  %v1082_v52 = vmul.f32 %v2410_v51, %v3156_v20  ;;  %v2417_v13 = vld [vmem:[%s2818_s20 + $0x240] sm:$0xff]  ;;  %v2418_v16 = vld [vmem:[%s2818_s20 + $0x248] sm:$0xff] }
 0x288   : > { %1192 = vst [vmem:[%s3163_s5 + $0x178] sm:$0xff] %v1064_v0  ;;  %1193 = vst [vmem:[%s3163_s5 + $0x180] sm:$0xff] %v1065_v53  ;;  %v1083_v0 = vmul.f32 %v2411_v59, %v3154_v18  ;;  %v1084_v53 = vmul.f32 %v2412_v2, %v3156_v20  ;;  %v2419_v61 = vld [vmem:[%s2818_s20 + $0x250] sm:$0xff]  ;;  %v2420_v3 = vld [vmem:[%s2818_s20 + $0x258] sm:$0xff] }
 0x289   : > { %1194 = vst [vmem:[%s3163_s5 + $0x188] sm:$0xff] %v1066_v6  ;;  %1195 = vst [vmem:[%s3163_s5 + $0x190] sm:$0xff] %v1067_v58  ;;  %v1085_v6 = vmul.f32 %v2413_v55, %v3154_v18  ;;  %v1086_v58 = vmul.f32 %v2414_v8, %v3156_v20  ;;  %v2421_v25 = vld [vmem:[%s2818_s20 + $0x260] sm:$0xff]  ;;  %v2422_v27 = vld [vmem:[%s2818_s20 + $0x268] sm:$0xff] }
 0x28a   : > { %1196 = vst [vmem:[%s3163_s5 + $0x198] sm:$0xff] %v1068_v9  ;;  %1197 = vst [vmem:[%s3163_s5 + $0x1a0] sm:$0xff] %v1069_v11  ;;  %v1087_v9 = vmul.f32 %v2415_v60, %v3154_v18  ;;  %v1088_v11 = vmul.f32 %v2416_v10, %v3156_v20  ;;  %v2423_v30 = vld [vmem:[%s2818_s20 + $0x270] sm:$0xff]  ;;  %v2424_v34 = vld [vmem:[%s2818_s20 + $0x278] sm:$0xff] }
 0x28b   : > { %1198 = vst [vmem:[%s3163_s5 + $0x1a8] sm:$0xff] %v1070_v14  ;;  %1199 = vst [vmem:[%s3163_s5 + $0x1b0] sm:$0xff] %v1071_v17  ;;  %v1089_v14 = vmul.f32 %v2417_v13, %v3154_v18  ;;  %v1090_v17 = vmul.f32 %v2418_v16, %v3156_v20  ;;  %v2425_v37 = vld [vmem:[%s2818_s20 + $0x280] sm:$0xff]  ;;  %v2426_v41 = vld [vmem:[%s2818_s20 + $0x288] sm:$0xff] }
 0x28c   : > { %1200 = vst [vmem:[%s3163_s5 + $0x1b8] sm:$0xff] %v1072_v1  ;;  %1201 = vst [vmem:[%s3163_s5 + $0x1c0] sm:$0xff] %v1073_v4  ;;  %v1091_v1 = vmul.f32 %v2419_v61, %v3154_v18  ;;  %v1092_v4 = vmul.f32 %v2420_v3, %v3156_v20  ;;  %v2427_v44 = vld [vmem:[%s2818_s20 + $0x290] sm:$0xff]  ;;  %v2428_v46 = vld [vmem:[%s2818_s20 + $0x298] sm:$0xff] }
 0x28d   : > { %1202 = vst [vmem:[%s3163_s5 + $0x1c8] sm:$0xff] %v1074_v26  ;;  %1203 = vst [vmem:[%s3163_s5 + $0x1d0] sm:$0xff] %v1075_v28  ;;  %v1093_v26 = vmul.f32 %v2421_v25, %v3154_v18  ;;  %v1094_v28 = vmul.f32 %v2422_v27, %v3156_v20  ;;  %v2429_v51 = vld [vmem:[%s2818_s20 + $0x2a0] sm:$0xff]  ;;  %v2430_v59 = vld [vmem:[%s2818_s20 + $0x2a8] sm:$0xff] }
 0x28e   : > { %1204 = vst [vmem:[%s3163_s5 + $0x1d8] sm:$0xff] %v1076_v33  ;;  %1205 = vst [vmem:[%s3163_s5 + $0x1e0] sm:$0xff] %v1077_v35  ;;  %v1095_v33 = vmul.f32 %v2423_v30, %v3154_v18  ;;  %v1096_v35 = vmul.f32 %v2424_v34, %v3156_v20  ;;  %v2431_v2 = vld [vmem:[%s2818_s20 + $0x2b0] sm:$0xff]  ;;  %v2432_v55 = vld [vmem:[%s2818_s20 + $0x2b8] sm:$0xff] }
 0x28f   : > { %1206 = vst [vmem:[%s3163_s5 + $0x1e8] sm:$0xff] %v1078_v39  ;;  %1207 = vst [vmem:[%s3163_s5 + $0x1f0] sm:$0xff] %v1079_v42  ;;  %v1097_v39 = vmul.f32 %v2425_v37, %v3154_v18  ;;  %v1098_v42 = vmul.f32 %v2426_v41, %v3156_v20  ;;  %v2433_v8 = vld [vmem:[%s2818_s20 + $0x2c0] sm:$0xff]  ;;  %v2434_v60 = vld [vmem:[%s2818_s20 + $0x2c8] sm:$0xff] }
 0x290   : > { %1208 = vst [vmem:[%s3163_s5 + $0x1f8] sm:$0xff] %v1080_v45  ;;  %1209 = vst [vmem:[%s3163_s5 + $0x200] sm:$0xff] %v1081_v49  ;;  %v1099_v45 = vmul.f32 %v2427_v44, %v3154_v18  ;;  %v1100_v49 = vmul.f32 %v2428_v46, %v3156_v20  ;;  %v2435_v10 = vld [vmem:[%s2818_s20 + $0x2d0] sm:$0xff]  ;;  %v2436_v13 = vld [vmem:[%s2818_s20 + $0x2d8] sm:$0xff] }
 0x291   : > { %1210 = vst [vmem:[%s3163_s5 + $0x208] sm:$0xff] %v1082_v52  ;;  %1211 = vst [vmem:[%s3163_s5 + $0x210] sm:$0xff] %v1083_v0  ;;  %v1101_v52 = vmul.f32 %v2429_v51, %v3154_v18  ;;  %v1102_v0 = vmul.f32 %v2430_v59, %v3156_v20  ;;  %v2437_v16 = vld [vmem:[%s2818_s20 + $0x2e0] sm:$0xff]  ;;  %v2438_v61 = vld [vmem:[%s2818_s20 + $0x2e8] sm:$0xff] }
 0x292   : > { %1212 = vst [vmem:[%s3163_s5 + $0x218] sm:$0xff] %v1084_v53  ;;  %1213 = vst [vmem:[%s3163_s5 + $0x220] sm:$0xff] %v1085_v6  ;;  %v1103_v53 = vmul.f32 %v2431_v2, %v3154_v18  ;;  %v1104_v6 = vmul.f32 %v2432_v55, %v3156_v20  ;;  %v2439_v3 = vld [vmem:[%s2818_s20 + $0x2f0] sm:$0xff]  ;;  %v2440_v25 = vld [vmem:[%s2818_s20 + $0x2f8] sm:$0xff]  ;;  %v1123_v55 = vmul.f32 %v3154_v18, %v3033_v31 }
 0x293   : > { %1214 = vst [vmem:[%s3163_s5 + $0x228] sm:$0xff] %v1086_v58  ;;  %1215 = vst [vmem:[%s3163_s5 + $0x230] sm:$0xff] %v1087_v9  ;;  %v1105_v58 = vmul.f32 %v2433_v8, %v3154_v18  ;;  %v1106_v9 = vmul.f32 %v2434_v60, %v3156_v20  ;;  %v2441_v27 = vld [vmem:[%s2818_s20 + $0x300] sm:$0xff]  ;;  %v2442_v30 = vld [vmem:[%s2818_s20 + $0x308] sm:$0xff]  ;;  %v1125_v8 = vmul.f32 %v3154_v18, %v3041_v43 }
 0x294   : > { %1216 = vst [vmem:[%s3163_s5 + $0x238] sm:$0xff] %v1088_v11  ;;  %1217 = vst [vmem:[%s3163_s5 + $0x240] sm:$0xff] %v1089_v14  ;;  %v1107_v11 = vmul.f32 %v2435_v10, %v3154_v18  ;;  %v1108_v14 = vmul.f32 %v2436_v13, %v3156_v20  ;;  %v2443_v34 = vld [vmem:[%s2818_s20 + $0x310] sm:$0xff]  ;;  %v2444_v37 = vld [vmem:[%s2818_s20 + $0x318] sm:$0xff]  ;;  %v1127_v31 = vmul.f32 %v3154_v18, %v3051_v57 }
 0x295   : > { %1218 = vst [vmem:[%s3163_s5 + $0x248] sm:$0xff] %v1090_v17  ;;  %1219 = vst [vmem:[%s3163_s5 + $0x250] sm:$0xff] %v1091_v1  ;;  %v1109_v17 = vmul.f32 %v2437_v16, %v3154_v18  ;;  %v1110_v1 = vmul.f32 %v2438_v61, %v3156_v20  ;;  %v2445_v41 = vld [vmem:[%s2818_s20 + $0x320] sm:$0xff]  ;;  %v2446_v44 = vld [vmem:[%s2818_s20 + $0x328] sm:$0xff]  ;;  %v1129_v43 = vmul.f32 %v3154_v18, %v3061_v5 }
 0x296   : > { %1220 = vst [vmem:[%s3163_s5 + $0x258] sm:$0xff] %v1092_v4  ;;  %1221 = vst [vmem:[%s3163_s5 + $0x260] sm:$0xff] %v1093_v26  ;;  %v1111_v4 = vmul.f32 %v2439_v3, %v3154_v18  ;;  %v1112_v26 = vmul.f32 %v2440_v25, %v3156_v20  ;;  %v2447_v46 = vld [vmem:[%s2818_s20 + $0x330] sm:$0xff]  ;;  %v2448_v51 = vld [vmem:[%s2818_s20 + $0x338] sm:$0xff]  ;;  %v1131_v57 = vmul.f32 %v3154_v18, %v3071_v19 }
 0x297   : > { %1222 = vst [vmem:[%s3163_s5 + $0x268] sm:$0xff] %v1094_v28  ;;  %1223 = vst [vmem:[%s3163_s5 + $0x270] sm:$0xff] %v1095_v33  ;;  %v1113_v28 = vmul.f32 %v2441_v27, %v3154_v18  ;;  %v1114_v33 = vmul.f32 %v2442_v30, %v3156_v20  ;;  %v2449_v59 = vld [vmem:[%s2818_s20 + $0x340] sm:$0xff]  ;;  %v2450_v2 = vld [vmem:[%s2818_s20 + $0x348] sm:$0xff]  ;;  %v1133_v5 = vmul.f32 %v3154_v18, %v3081_v32 }
 0x298   : > { %1224 = vst [vmem:[%s3163_s5 + $0x278] sm:$0xff] %v1096_v35  ;;  %1225 = vst [vmem:[%s3163_s5 + $0x280] sm:$0xff] %v1097_v39  ;;  %v1115_v35 = vmul.f32 %v2443_v34, %v3154_v18  ;;  %v1116_v39 = vmul.f32 %v2444_v37, %v3156_v20  ;;  %v1135_v19 = vmul.f32 %v3154_v18, %v3091_v48  ;;  %v2451_v60 = vld [vmem:[%s2818_s20 + $0x400] sm:$0xff]  ;;  %v2452_v10 = vld [vmem:[%s2818_s20 + $0x408] sm:$0xff] }
 0x299   : > { %1226 = vst [vmem:[%s3163_s5 + $0x288] sm:$0xff] %v1098_v42  ;;  %1227 = vst [vmem:[%s3163_s5 + $0x290] sm:$0xff] %v1099_v45  ;;  %v1117_v42 = vmul.f32 %v2445_v41, %v3154_v18  ;;  %v1118_v45 = vmul.f32 %v2446_v44, %v3156_v20  ;;  %v1137_v32 = vmul.f32 %v3154_v18, %v3101_v63  ;;  %v2453_v13 = vld [vmem:[%s2818_s20 + $0x410] sm:$0xff]  ;;  %v2455_v16 = vld [vmem:[%s2818_s20 + $0x420] sm:$0xff] }
 0x29a   : > { %1228 = vst [vmem:[%s3163_s5 + $0x298] sm:$0xff] %v1100_v49  ;;  %1229 = vst [vmem:[%s3163_s5 + $0x2a0] sm:$0xff] %v1101_v52  ;;  %v1119_v49 = vmul.f32 %v2447_v46, %v3154_v18  ;;  %v1120_v52 = vmul.f32 %v2448_v51, %v3156_v20  ;;  %v1139_v48 = vmul.f32 %v3154_v18, %v3111_v15  ;;  %v2456_v61 = vld [vmem:[%s2818_s20 + $0x428] sm:$0xff]  ;;  %v2457_v3 = vld [vmem:[%s2818_s20 + $0x430] sm:$0xff] }
 0x29b   : > { %1230 = vst [vmem:[%s3163_s5 + $0x2a8] sm:$0xff] %v1102_v0  ;;  %1231 = vst [vmem:[%s3163_s5 + $0x2b0] sm:$0xff] %v1103_v53  ;;  %v1121_v0 = vmul.f32 %v2449_v59, %v3154_v18  ;;  %v1122_v53 = vmul.f32 %v2450_v2, %v3156_v20  ;;  %v1141_v63 = vmul.f32 %v3154_v18, %v3121_v29  ;;  %v1713_v29 = vrot.slane %v3165_v22, 1  ;;  %v2458_v25 = vld [vmem:[%s2818_s20 + $0x438] sm:$0xff]  ;;  %v2459_v27 = vld [vmem:[%s2818_s20 + $0x440] sm:$0xff] }
 0x29c   : > { %1232 = vst [vmem:[%s3163_s5 + $0x2b8] sm:$0xff] %v1104_v6  ;;  %1233 = vst [vmem:[%s3163_s5 + $0x2c0] sm:$0xff] %v1105_v58  ;;  %v1124_v6 = vmul.f32 %v3156_v20, %v3036_v36  ;;  %v1126_v58 = vmul.f32 %v3156_v20, %v3044_v50  ;;  %v1128_v36 = vmul.f32 %v3156_v20, %v3054_v62  ;;  %v2460_v30 = vld [vmem:[%s2818_s20 + $0x448] sm:$0xff]  ;;  %v2461_v34 = vld [vmem:[%s2818_s20 + $0x450] sm:$0xff] }
 0x29d   : > { %1234 = vst [vmem:[%s3163_s5 + $0x2c8] sm:$0xff] %v1106_v9  ;;  %1235 = vst [vmem:[%s3163_s5 + $0x2d0] sm:$0xff] %v1107_v11  ;;  %v1130_v50 = vmul.f32 %v3156_v20, %v3064_v12  ;;  %v1132_v62 = vmul.f32 %v3156_v20, %v3074_v24  ;;  %v1134_v12 = vmul.f32 %v3156_v20, %v3084_v40  ;;  %v2462_v37 = vld [vmem:[%s2818_s20 + $0x458] sm:$0xff]  ;;  %v2463_v41 = vld [vmem:[%s2818_s20 + $0x460] sm:$0xff] }
 0x29e   : > { %1236 = vst [vmem:[%s3163_s5 + $0x2d8] sm:$0xff] %v1108_v14  ;;  %1237 = vst [vmem:[%s3163_s5 + $0x2e0] sm:$0xff] %v1109_v17  ;;  %v1136_v24 = vmul.f32 %v3156_v20, %v3094_v54  ;;  %v1138_v40 = vmul.f32 %v3156_v20, %v3104_v7  ;;  %v1140_v54 = vmul.f32 %v3156_v20, %v3114_v21  ;;  %v2454_v14 = vld [vmem:[%s2818_s20 + $0x418] sm:$0xff]  ;;  %v2464_v44 = vld [vmem:[%s2818_s20 + $0x468] sm:$0xff] }
 0x29f   : > { %1238 = vst [vmem:[%s3163_s5 + $0x2e8] sm:$0xff] %v1110_v1  ;;  %1239 = vst [vmem:[%s3163_s5 + $0x2f0] sm:$0xff] %v1111_v4  ;;  %v1142_v7 = vmul.f32 %v3156_v20, %v3124_v38  ;;  %v1143_v15 = vmul.f32 %v3154_v18, %v3131_v47  ;;  %v1144_v21 = vmul.f32 %v3156_v20, %v3134_v56  ;;  %v1720_v38 = vrot.slane %v3167_v23, 1  ;;  %v2465_v46 = vld [vmem:[%s2818_s20 + $0x470] sm:$0xff]  ;;  %v2466_v51 = vld [vmem:[%s2818_s20 + $0x478] sm:$0xff] }
 0x2a0   : > { %1240 = vst [vmem:[%s3163_s5 + $0x2f8] sm:$0xff] %v1112_v26  ;;  %1241 = vst [vmem:[%s3163_s5 + $0x300] sm:$0xff] %v1113_v28  ;;  %v1714_v47 = vadd.f32 %v1713_v29, %v3165_v22  ;;  %v2467_v59 = vld [vmem:[%s2818_s20 + $0x480] sm:$0xff]  ;;  %v2468_v2 = vld [vmem:[%s2818_s20 + $0x488] sm:$0xff] }
 0x2a1   : > { %1242 = vst [vmem:[%s3163_s5 + $0x308] sm:$0xff] %v1114_v33  ;;  %1243 = vst [vmem:[%s3163_s5 + $0x310] sm:$0xff] %v1115_v35  ;;  %v1721_v56 = vadd.f32 %v1720_v38, %v3167_v23  ;;  %v2480_v29 = vld [vmem:[%s2818_s20 + $0x4e8] sm:$0xff] }
 0x2a2   : > { %1244 = vst [vmem:[%s3163_s5 + $0x318] sm:$0xff] %v1116_v39  ;;  %1245 = vst [vmem:[%s3163_s5 + $0x320] sm:$0xff] %v1117_v42  ;;  %v3557_v18 = vadd.f32 1.0, %v1714_v47  ;;  %v2481_v47 = vld [vmem:[%s2818_s20 + $0x4f0] sm:$0xff] }
 0x2a3   : > { %1246 = vst [vmem:[%s3163_s5 + $0x328] sm:$0xff] %v1118_v45  ;;  %1247 = vst [vmem:[%s3163_s5 + $0x330] sm:$0xff] %v1119_v49  ;;  %v3559_v20 = vadd.f32 1.0, %v1721_v56 }
 0x2a4   : > { %1248 = vst [vmem:[%s3163_s5 + $0x338] sm:$0xff] %v1120_v52  ;;  %1249 = vst [vmem:[%s3163_s5 + $0x340] sm:$0xff] %v1121_v0  ;;  %v1724_v9 = vmul.f32 %v2451_v60, %v3557_v18  ;;  %v1726_v22 = vmul.f32 %v2453_v13, %v3557_v18  ;;  %v1728_v17 = vmul.f32 %v2455_v16, %v3557_v18  ;;  %v2482_v60 = vld [vmem:[%s2818_s20 + $0x4f8] sm:$0xff]  ;;  %v2484_v13 = vld [vmem:[%s2818_s20 + $0x508] sm:$0xff] }
 0x2a5   : > { %1250 = vst [vmem:[%s3163_s5 + $0x348] sm:$0xff] %v1122_v53  ;;  %1251 = vst [vmem:[%s3163_s5 + $0x350] sm:$0xff] %v1123_v55  ;;  %v1725_v11 = vmul.f32 %v2452_v10, %v3559_v20  ;;  %v1727_v23 = vmul.f32 %v2454_v14, %v3559_v20  ;;  %v1729_v1 = vmul.f32 %v2456_v61, %v3559_v20  ;;  %v2469_v55 = vld [vmem:[%s2818_s20 + $0x490] sm:$0xff]  ;;  %v2483_v10 = vld [vmem:[%s2818_s20 + $0x500] sm:$0xff] }
 0x2a6   : > { %1252 = vst [vmem:[%s3163_s5 + $0x358] sm:$0xff] %v1124_v6  ;;  %1253 = vst [vmem:[%s3163_s5 + $0x360] sm:$0xff] %v1125_v8  ;;  %v1730_v4 = vmul.f32 %v2457_v3, %v3557_v18  ;;  %v1731_v26 = vmul.f32 %v2458_v25, %v3559_v20  ;;  %v1732_v28 = vmul.f32 %v2459_v27, %v3557_v18  ;;  %v2470_v8 = vld [vmem:[%s2818_s20 + $0x498] sm:$0xff]  ;;  %v2485_v14 = vld [vmem:[%s2818_s20 + $0x510] sm:$0xff] }
 0x2a7   : > { %1254 = vst [vmem:[%s3163_s5 + $0x368] sm:$0xff] %v1126_v58  ;;  %1255 = vst [vmem:[%s3163_s5 + $0x370] sm:$0xff] %v1127_v31  ;;  %v1733_v33 = vmul.f32 %v2460_v30, %v3559_v20  ;;  %v1734_v35 = vmul.f32 %v2461_v34, %v3557_v18  ;;  %v1735_v39 = vmul.f32 %v2462_v37, %v3559_v20  ;;  %v2471_v31 = vld [vmem:[%s2818_s20 + $0x4a0] sm:$0xff]  ;;  %v2486_v16 = vld [vmem:[%s2818_s20 + $0x518] sm:$0xff] }
 0x2a8   : > { %1256 = vst [vmem:[%s3163_s5 + $0x378] sm:$0xff] %v1128_v36  ;;  %1257 = vst [vmem:[%s3163_s5 + $0x380] sm:$0xff] %v1129_v43  ;;  %v1736_v42 = vmul.f32 %v2463_v41, %v3557_v18  ;;  %v1737_v45 = vmul.f32 %v2464_v44, %v3559_v20  ;;  %v1738_v49 = vmul.f32 %v2465_v46, %v3557_v18  ;;  %v2472_v43 = vld [vmem:[%s2818_s20 + $0x4a8] sm:$0xff]  ;;  %v2487_v61 = vld [vmem:[%s2818_s20 + $0x520] sm:$0xff] }
 0x2a9   : > { %1258 = vst [vmem:[%s3163_s5 + $0x388] sm:$0xff] %v1130_v50  ;;  %1259 = vst [vmem:[%s3163_s5 + $0x390] sm:$0xff] %v1131_v57  ;;  %v1739_v52 = vmul.f32 %v2466_v51, %v3559_v20  ;;  %v1740_v0 = vmul.f32 %v2467_v59, %v3557_v18  ;;  %v1741_v53 = vmul.f32 %v2468_v2, %v3559_v20  ;;  %v2473_v57 = vld [vmem:[%s2818_s20 + $0x4b0] sm:$0xff]  ;;  %v2488_v3 = vld [vmem:[%s2818_s20 + $0x528] sm:$0xff] }
 0x2aa   : > { %1260 = vst [vmem:[%s3163_s5 + $0x398] sm:$0xff] %v1132_v62  ;;  %1261 = vst [vmem:[%s3163_s5 + $0x3a0] sm:$0xff] %v1133_v5  ;;  %v1742_v6 = vmul.f32 %v2469_v55, %v3557_v18  ;;  %v1743_v58 = vmul.f32 %v2470_v8, %v3559_v20  ;;  %v1744_v36 = vmul.f32 %v2471_v31, %v3557_v18  ;;  %v2474_v5 = vld [vmem:[%s2818_s20 + $0x4b8] sm:$0xff]  ;;  %v2489_v25 = vld [vmem:[%s2818_s20 + $0x530] sm:$0xff] }
 0x2ab   : > { %1262 = vst [vmem:[%s3163_s5 + $0x3a8] sm:$0xff] %v1134_v12  ;;  %1263 = vst [vmem:[%s3163_s5 + $0x3b0] sm:$0xff] %v1135_v19  ;;  %v1745_v50 = vmul.f32 %v2472_v43, %v3559_v20  ;;  %v1746_v62 = vmul.f32 %v2473_v57, %v3557_v18  ;;  %v1747_v12 = vmul.f32 %v2474_v5, %v3559_v20  ;;  %v2475_v19 = vld [vmem:[%s2818_s20 + $0x4c0] sm:$0xff]  ;;  %v2490_v27 = vld [vmem:[%s2818_s20 + $0x538] sm:$0xff] }
 0x2ac   : > { %1264 = vst [vmem:[%s3163_s5 + $0x3b8] sm:$0xff] %v1136_v24  ;;  %1265 = vst [vmem:[%s3163_s5 + $0x3c0] sm:$0xff] %v1137_v32  ;;  %v1748_v24 = vmul.f32 %v2475_v19, %v3557_v18  ;;  %v2476_v32 = vld [vmem:[%s2818_s20 + $0x4c8] sm:$0xff]  ;;  %v1753_v38 = vmul.f32 %v2480_v29, %v3559_v20  ;;  %v1754_v56 = vmul.f32 %v2481_v47, %v3557_v18  ;;  %v2491_v30 = vld [vmem:[%s2818_s20 + $0x540] sm:$0xff] }
 0x2ad   : > { %1266 = vst [vmem:[%s3163_s5 + $0x3c8] sm:$0xff] %v1138_v40  ;;  %1267 = vst [vmem:[%s3163_s5 + $0x3d0] sm:$0xff] %v1139_v48  ;;  %v1749_v40 = vmul.f32 %v2476_v32, %v3559_v20  ;;  %v2477_v48 = vld [vmem:[%s2818_s20 + $0x4d0] sm:$0xff]  ;;  %v2492_v34 = vld [vmem:[%s2818_s20 + $0x548] sm:$0xff] }
 0x2ae   : > { %1268 = vst [vmem:[%s3163_s5 + $0x3d8] sm:$0xff] %v1140_v54  ;;  %1269 = vst [vmem:[%s3163_s5 + $0x3e0] sm:$0xff] %v1141_v63  ;;  %v1750_v54 = vmul.f32 %v2477_v48, %v3557_v18  ;;  %v2478_v63 = vld [vmem:[%s2818_s20 + $0x4d8] sm:$0xff]  ;;  %v2493_v37 = vld [vmem:[%s2818_s20 + $0x550] sm:$0xff] }
 0x2af   : > { %1270 = vst [vmem:[%s3163_s5 + $0x3e8] sm:$0xff] %v1142_v7  ;;  %1271 = vst [vmem:[%s3163_s5 + $0x3f0] sm:$0xff] %v1143_v15  ;;  %v1751_v7 = vmul.f32 %v2478_v63, %v3559_v20  ;;  %v2479_v15 = vld [vmem:[%s2818_s20 + $0x4e0] sm:$0xff]  ;;  %v2494_v41 = vld [vmem:[%s2818_s20 + $0x558] sm:$0xff] }
 0x2b0   : > { %1272 = vst [vmem:[%s3163_s5 + $0x3f8] sm:$0xff] %v1144_v21  ;;  %2178 = vst [vmem:[%s3163_s5 + $0x400] sm:$0xff] %v1724_v9  ;;  %v1752_v21 = vmul.f32 %v2479_v15, %v3557_v18  ;;  %v1755_v9 = vmul.f32 %v2482_v60, %v3559_v20  ;;  %v2495_v44 = vld [vmem:[%s2818_s20 + $0x560] sm:$0xff]  ;;  %v2496_v46 = vld [vmem:[%s2818_s20 + $0x568] sm:$0xff] }
 0x2b1   : > { %2179 = vst [vmem:[%s3163_s5 + $0x408] sm:$0xff] %v1725_v11  ;;  %2180 = vst [vmem:[%s3163_s5 + $0x410] sm:$0xff] %v1726_v22  ;;  %v1756_v11 = vmul.f32 %v2483_v10, %v3557_v18  ;;  %v1757_v22 = vmul.f32 %v2484_v13, %v3559_v20  ;;  %v2497_v51 = vld [vmem:[%s2818_s20 + $0x570] sm:$0xff]  ;;  %v2498_v59 = vld [vmem:[%s2818_s20 + $0x578] sm:$0xff] }
 0x2b2   : > { %2181 = vst [vmem:[%s3163_s5 + $0x418] sm:$0xff] %v1727_v23  ;;  %2182 = vst [vmem:[%s3163_s5 + $0x420] sm:$0xff] %v1728_v17  ;;  %v1758_v23 = vmul.f32 %v2485_v14, %v3557_v18  ;;  %v1759_v17 = vmul.f32 %v2486_v16, %v3559_v20  ;;  %v2499_v2 = vld [vmem:[%s2818_s20 + $0x580] sm:$0xff]  ;;  %v2500_v55 = vld [vmem:[%s2818_s20 + $0x588] sm:$0xff] }
 0x2b3   : > { %2183 = vst [vmem:[%s3163_s5 + $0x428] sm:$0xff] %v1729_v1  ;;  %2184 = vst [vmem:[%s3163_s5 + $0x430] sm:$0xff] %v1730_v4  ;;  %v1760_v1 = vmul.f32 %v2487_v61, %v3557_v18  ;;  %v1761_v4 = vmul.f32 %v2488_v3, %v3559_v20  ;;  %v2501_v8 = vld [vmem:[%s2818_s20 + $0x590] sm:$0xff]  ;;  %v2502_v31 = vld [vmem:[%s2818_s20 + $0x598] sm:$0xff] }
 0x2b4   : > { %2185 = vst [vmem:[%s3163_s5 + $0x438] sm:$0xff] %v1731_v26  ;;  %2186 = vst [vmem:[%s3163_s5 + $0x440] sm:$0xff] %v1732_v28  ;;  %v1762_v26 = vmul.f32 %v2489_v25, %v3557_v18  ;;  %v1763_v28 = vmul.f32 %v2490_v27, %v3559_v20  ;;  %v2503_v43 = vld [vmem:[%s2818_s20 + $0x5a0] sm:$0xff]  ;;  %v2504_v57 = vld [vmem:[%s2818_s20 + $0x5a8] sm:$0xff] }
 0x2b5   : > { %2187 = vst [vmem:[%s3163_s5 + $0x448] sm:$0xff] %v1733_v33  ;;  %2188 = vst [vmem:[%s3163_s5 + $0x450] sm:$0xff] %v1734_v35  ;;  %v1764_v33 = vmul.f32 %v2491_v30, %v3557_v18  ;;  %v1765_v35 = vmul.f32 %v2492_v34, %v3559_v20  ;;  %v2505_v5 = vld [vmem:[%s2818_s20 + $0x5b0] sm:$0xff]  ;;  %v2506_v19 = vld [vmem:[%s2818_s20 + $0x5b8] sm:$0xff] }
 0x2b6   : > { %2189 = vst [vmem:[%s3163_s5 + $0x458] sm:$0xff] %v1735_v39  ;;  %2190 = vst [vmem:[%s3163_s5 + $0x460] sm:$0xff] %v1736_v42  ;;  %v1766_v39 = vmul.f32 %v2493_v37, %v3557_v18  ;;  %v1767_v42 = vmul.f32 %v2494_v41, %v3559_v20  ;;  %v2507_v32 = vld [vmem:[%s2818_s20 + $0x5c0] sm:$0xff]  ;;  %v2508_v48 = vld [vmem:[%s2818_s20 + $0x5c8] sm:$0xff] }
 0x2b7   : > { %2191 = vst [vmem:[%s3163_s5 + $0x468] sm:$0xff] %v1737_v45  ;;  %2192 = vst [vmem:[%s3163_s5 + $0x470] sm:$0xff] %v1738_v49  ;;  %v1768_v45 = vmul.f32 %v2495_v44, %v3557_v18  ;;  %v1769_v49 = vmul.f32 %v2496_v46, %v3559_v20  ;;  %v2509_v63 = vld [vmem:[%s2818_s20 + $0x5d0] sm:$0xff]  ;;  %v2510_v15 = vld [vmem:[%s2818_s20 + $0x5d8] sm:$0xff] }
 0x2b8   : > { %2193 = vst [vmem:[%s3163_s5 + $0x478] sm:$0xff] %v1739_v52  ;;  %2194 = vst [vmem:[%s3163_s5 + $0x480] sm:$0xff] %v1740_v0  ;;  %v1770_v52 = vmul.f32 %v2497_v51, %v3557_v18  ;;  %v1771_v0 = vmul.f32 %v2498_v59, %v3559_v20  ;;  %v2511_v29 = vld [vmem:[%s2818_s20 + $0x5e0] sm:$0xff]  ;;  %v2512_v47 = vld [vmem:[%s2818_s20 + $0x5e8] sm:$0xff] }
 0x2b9   : > { %2195 = vst [vmem:[%s3163_s5 + $0x488] sm:$0xff] %v1741_v53  ;;  %2196 = vst [vmem:[%s3163_s5 + $0x490] sm:$0xff] %v1742_v6  ;;  %v1772_v53 = vmul.f32 %v2499_v2, %v3557_v18  ;;  %v1773_v6 = vmul.f32 %v2500_v55, %v3559_v20  ;;  %v2513_v60 = vld [vmem:[%s2818_s20 + $0x5f0] sm:$0xff]  ;;  %v2514_v10 = vld [vmem:[%s2818_s20 + $0x5f8] sm:$0xff] }
 0x2ba   : > { %2197 = vst [vmem:[%s3163_s5 + $0x498] sm:$0xff] %v1743_v58  ;;  %2198 = vst [vmem:[%s3163_s5 + $0x4a0] sm:$0xff] %v1744_v36  ;;  %v1774_v58 = vmul.f32 %v2501_v8, %v3557_v18  ;;  %v1775_v36 = vmul.f32 %v2502_v31, %v3559_v20  ;;  %v2515_v13 = vld [vmem:[%s2818_s20 + $0x600] sm:$0xff]  ;;  %v2516_v14 = vld [vmem:[%s2818_s20 + $0x608] sm:$0xff] }
 0x2bb   : > { %2199 = vst [vmem:[%s3163_s5 + $0x4a8] sm:$0xff] %v1745_v50  ;;  %2200 = vst [vmem:[%s3163_s5 + $0x4b0] sm:$0xff] %v1746_v62  ;;  %v1776_v50 = vmul.f32 %v2503_v43, %v3557_v18  ;;  %v1777_v62 = vmul.f32 %v2504_v57, %v3559_v20  ;;  %v2517_v16 = vld [vmem:[%s2818_s20 + $0x610] sm:$0xff]  ;;  %v2518_v61 = vld [vmem:[%s2818_s20 + $0x618] sm:$0xff] }
 0x2bc   : > { %2201 = vst [vmem:[%s3163_s5 + $0x4b8] sm:$0xff] %v1747_v12  ;;  %2202 = vst [vmem:[%s3163_s5 + $0x4c0] sm:$0xff] %v1748_v24  ;;  %v1778_v12 = vmul.f32 %v2505_v5, %v3557_v18  ;;  %v1779_v24 = vmul.f32 %v2506_v19, %v3559_v20  ;;  %v2519_v3 = vld [vmem:[%s2818_s20 + $0x620] sm:$0xff]  ;;  %v2520_v25 = vld [vmem:[%s2818_s20 + $0x628] sm:$0xff] }
 0x2bd   : > { %2203 = vst [vmem:[%s3163_s5 + $0x4c8] sm:$0xff] %v1749_v40  ;;  %2204 = vst [vmem:[%s3163_s5 + $0x4d0] sm:$0xff] %v1750_v54  ;;  %v1780_v40 = vmul.f32 %v2507_v32, %v3557_v18  ;;  %v1781_v54 = vmul.f32 %v2508_v48, %v3559_v20  ;;  %v2521_v27 = vld [vmem:[%s2818_s20 + $0x630] sm:$0xff]  ;;  %v2522_v30 = vld [vmem:[%s2818_s20 + $0x638] sm:$0xff] }
 0x2be   : > { %2205 = vst [vmem:[%s3163_s5 + $0x4d8] sm:$0xff] %v1751_v7  ;;  %2206 = vst [vmem:[%s3163_s5 + $0x4e0] sm:$0xff] %v1752_v21  ;;  %v1782_v7 = vmul.f32 %v2509_v63, %v3557_v18  ;;  %v1783_v21 = vmul.f32 %v2510_v15, %v3559_v20  ;;  %v2523_v34 = vld [vmem:[%s2818_s20 + $0x640] sm:$0xff]  ;;  %v2524_v37 = vld [vmem:[%s2818_s20 + $0x648] sm:$0xff] }
 0x2bf   : > { %2207 = vst [vmem:[%s3163_s5 + $0x4e8] sm:$0xff] %v1753_v38  ;;  %2208 = vst [vmem:[%s3163_s5 + $0x4f0] sm:$0xff] %v1754_v56  ;;  %v1784_v38 = vmul.f32 %v2511_v29, %v3557_v18  ;;  %v1785_v56 = vmul.f32 %v2512_v47, %v3559_v20  ;;  %v2525_v41 = vld [vmem:[%s2818_s20 + $0x650] sm:$0xff]  ;;  %v2526_v44 = vld [vmem:[%s2818_s20 + $0x658] sm:$0xff] }
 0x2c0   : > { %2209 = vst [vmem:[%s3163_s5 + $0x4f8] sm:$0xff] %v1755_v9  ;;  %2210 = vst [vmem:[%s3163_s5 + $0x500] sm:$0xff] %v1756_v11  ;;  %v1786_v9 = vmul.f32 %v2513_v60, %v3557_v18  ;;  %v1787_v11 = vmul.f32 %v2514_v10, %v3559_v20  ;;  %v2527_v46 = vld [vmem:[%s2818_s20 + $0x660] sm:$0xff]  ;;  %v2528_v51 = vld [vmem:[%s2818_s20 + $0x668] sm:$0xff] }
 0x2c1   : > { %2211 = vst [vmem:[%s3163_s5 + $0x508] sm:$0xff] %v1757_v22  ;;  %2212 = vst [vmem:[%s3163_s5 + $0x510] sm:$0xff] %v1758_v23  ;;  %v1788_v22 = vmul.f32 %v2515_v13, %v3557_v18  ;;  %v1789_v23 = vmul.f32 %v2516_v14, %v3559_v20  ;;  %v2529_v59 = vld [vmem:[%s2818_s20 + $0x670] sm:$0xff]  ;;  %v2530_v2 = vld [vmem:[%s2818_s20 + $0x678] sm:$0xff] }
 0x2c2   : > { %2213 = vst [vmem:[%s3163_s5 + $0x518] sm:$0xff] %v1759_v17  ;;  %2214 = vst [vmem:[%s3163_s5 + $0x520] sm:$0xff] %v1760_v1  ;;  %v1790_v17 = vmul.f32 %v2517_v16, %v3557_v18  ;;  %v1791_v1 = vmul.f32 %v2518_v61, %v3559_v20  ;;  %v2531_v55 = vld [vmem:[%s2818_s20 + $0x680] sm:$0xff]  ;;  %v2532_v8 = vld [vmem:[%s2818_s20 + $0x688] sm:$0xff] }
 0x2c3   : > { %2215 = vst [vmem:[%s3163_s5 + $0x528] sm:$0xff] %v1761_v4  ;;  %2216 = vst [vmem:[%s3163_s5 + $0x530] sm:$0xff] %v1762_v26  ;;  %v1792_v4 = vmul.f32 %v2519_v3, %v3557_v18  ;;  %v1793_v26 = vmul.f32 %v2520_v25, %v3559_v20  ;;  %v2533_v31 = vld [vmem:[%s2818_s20 + $0x690] sm:$0xff]  ;;  %v2534_v43 = vld [vmem:[%s2818_s20 + $0x698] sm:$0xff] }
 0x2c4   : > { %2217 = vst [vmem:[%s3163_s5 + $0x538] sm:$0xff] %v1763_v28  ;;  %2218 = vst [vmem:[%s3163_s5 + $0x540] sm:$0xff] %v1764_v33  ;;  %v1794_v28 = vmul.f32 %v2521_v27, %v3557_v18  ;;  %v1795_v33 = vmul.f32 %v2522_v30, %v3559_v20  ;;  %v2535_v57 = vld [vmem:[%s2818_s20 + $0x6a0] sm:$0xff]  ;;  %v2536_v5 = vld [vmem:[%s2818_s20 + $0x6a8] sm:$0xff] }
 0x2c5   : > { %2219 = vst [vmem:[%s3163_s5 + $0x548] sm:$0xff] %v1765_v35  ;;  %2220 = vst [vmem:[%s3163_s5 + $0x550] sm:$0xff] %v1766_v39  ;;  %v1796_v35 = vmul.f32 %v2523_v34, %v3557_v18  ;;  %v1797_v39 = vmul.f32 %v2524_v37, %v3559_v20  ;;  %v2537_v19 = vld [vmem:[%s2818_s20 + $0x6b0] sm:$0xff]  ;;  %v2538_v32 = vld [vmem:[%s2818_s20 + $0x6b8] sm:$0xff] }
 0x2c6   : > { %2221 = vst [vmem:[%s3163_s5 + $0x558] sm:$0xff] %v1767_v42  ;;  %2222 = vst [vmem:[%s3163_s5 + $0x560] sm:$0xff] %v1768_v45  ;;  %v1798_v42 = vmul.f32 %v2525_v41, %v3557_v18  ;;  %v1799_v45 = vmul.f32 %v2526_v44, %v3559_v20  ;;  %v2539_v48 = vld [vmem:[%s2818_s20 + $0x6c0] sm:$0xff]  ;;  %v2540_v63 = vld [vmem:[%s2818_s20 + $0x6c8] sm:$0xff] }
 0x2c7   : > { %2223 = vst [vmem:[%s3163_s5 + $0x568] sm:$0xff] %v1769_v49  ;;  %2224 = vst [vmem:[%s3163_s5 + $0x570] sm:$0xff] %v1770_v52  ;;  %v1800_v49 = vmul.f32 %v2527_v46, %v3557_v18  ;;  %v1801_v52 = vmul.f32 %v2528_v51, %v3559_v20  ;;  %v2541_v15 = vld [vmem:[%s2818_s20 + $0x6d0] sm:$0xff]  ;;  %v2542_v29 = vld [vmem:[%s2818_s20 + $0x6d8] sm:$0xff] }
 0x2c8   : > { %2225 = vst [vmem:[%s3163_s5 + $0x578] sm:$0xff] %v1771_v0  ;;  %2226 = vst [vmem:[%s3163_s5 + $0x580] sm:$0xff] %v1772_v53  ;;  %v1802_v0 = vmul.f32 %v2529_v59, %v3557_v18  ;;  %v1803_v53 = vmul.f32 %v2530_v2, %v3559_v20  ;;  %v2543_v47 = vld [vmem:[%s2818_s20 + $0x6e0] sm:$0xff]  ;;  %v2544_v60 = vld [vmem:[%s2818_s20 + $0x6e8] sm:$0xff] }
 0x2c9   : > { %2227 = vst [vmem:[%s3163_s5 + $0x588] sm:$0xff] %v1773_v6  ;;  %2228 = vst [vmem:[%s3163_s5 + $0x590] sm:$0xff] %v1774_v58  ;;  %v1804_v6 = vmul.f32 %v2531_v55, %v3557_v18  ;;  %v1805_v58 = vmul.f32 %v2532_v8, %v3559_v20  ;;  %v2545_v10 = vld [vmem:[%s2818_s20 + $0x6f0] sm:$0xff]  ;;  %v2546_v13 = vld [vmem:[%s2818_s20 + $0x6f8] sm:$0xff] }
 0x2ca   : > { %2229 = vst [vmem:[%s3163_s5 + $0x598] sm:$0xff] %v1775_v36  ;;  %2230 = vst [vmem:[%s3163_s5 + $0x5a0] sm:$0xff] %v1776_v50  ;;  %v1806_v36 = vmul.f32 %v2533_v31, %v3557_v18  ;;  %v1807_v50 = vmul.f32 %v2534_v43, %v3559_v20  ;;  %v2547_v14 = vld [vmem:[%s2818_s20 + $0x700] sm:$0xff]  ;;  %v2548_v16 = vld [vmem:[%s2818_s20 + $0x708] sm:$0xff] }
 0x2cb   : > { %2231 = vst [vmem:[%s3163_s5 + $0x5a8] sm:$0xff] %v1777_v62  ;;  %2232 = vst [vmem:[%s3163_s5 + $0x5b0] sm:$0xff] %v1778_v12  ;;  %v1808_v62 = vmul.f32 %v2535_v57, %v3557_v18  ;;  %v1809_v12 = vmul.f32 %v2536_v5, %v3559_v20  ;;  %v2549_v61 = vld [vmem:[%s2818_s20 + $0x710] sm:$0xff]  ;;  %v2550_v3 = vld [vmem:[%s2818_s20 + $0x718] sm:$0xff] }
 0x2cc   : > { %2233 = vst [vmem:[%s3163_s5 + $0x5b8] sm:$0xff] %v1779_v24  ;;  %2234 = vst [vmem:[%s3163_s5 + $0x5c0] sm:$0xff] %v1780_v40  ;;  %v1810_v24 = vmul.f32 %v2537_v19, %v3557_v18  ;;  %v1811_v40 = vmul.f32 %v2538_v32, %v3559_v20  ;;  %v2551_v25 = vld [vmem:[%s2818_s20 + $0x720] sm:$0xff]  ;;  %v2552_v27 = vld [vmem:[%s2818_s20 + $0x728] sm:$0xff] }
 0x2cd   : > { %2235 = vst [vmem:[%s3163_s5 + $0x5c8] sm:$0xff] %v1781_v54  ;;  %2236 = vst [vmem:[%s3163_s5 + $0x5d0] sm:$0xff] %v1782_v7  ;;  %v1812_v54 = vmul.f32 %v2539_v48, %v3557_v18  ;;  %v1813_v7 = vmul.f32 %v2540_v63, %v3559_v20  ;;  %v2553_v30 = vld [vmem:[%s2818_s20 + $0x730] sm:$0xff]  ;;  %v2554_v34 = vld [vmem:[%s2818_s20 + $0x738] sm:$0xff] }
 0x2ce   : > { %2237 = vst [vmem:[%s3163_s5 + $0x5d8] sm:$0xff] %v1783_v21  ;;  %2238 = vst [vmem:[%s3163_s5 + $0x5e0] sm:$0xff] %v1784_v38  ;;  %v1814_v21 = vmul.f32 %v2541_v15, %v3557_v18  ;;  %v1815_v38 = vmul.f32 %v2542_v29, %v3559_v20  ;;  %v2555_v37 = vld [vmem:[%s2818_s20 + $0x740] sm:$0xff]  ;;  %v2556_v41 = vld [vmem:[%s2818_s20 + $0x748] sm:$0xff] }
 0x2cf   : > { %2239 = vst [vmem:[%s3163_s5 + $0x5e8] sm:$0xff] %v1785_v56  ;;  %2240 = vst [vmem:[%s3163_s5 + $0x5f0] sm:$0xff] %v1786_v9  ;;  %v1816_v56 = vmul.f32 %v2543_v47, %v3557_v18  ;;  %v1817_v9 = vmul.f32 %v2544_v60, %v3559_v20  ;;  %v2557_v44 = vld [vmem:[%s2818_s20 + $0x750] sm:$0xff]  ;;  %v2558_v46 = vld [vmem:[%s2818_s20 + $0x758] sm:$0xff] }
 0x2d0   : > { %2241 = vst [vmem:[%s3163_s5 + $0x5f8] sm:$0xff] %v1787_v11  ;;  %2242 = vst [vmem:[%s3163_s5 + $0x600] sm:$0xff] %v1788_v22  ;;  %v1818_v11 = vmul.f32 %v2545_v10, %v3557_v18  ;;  %v1819_v22 = vmul.f32 %v2546_v13, %v3559_v20  ;;  %v2559_v51 = vld [vmem:[%s2818_s20 + $0x760] sm:$0xff]  ;;  %v2560_v59 = vld [vmem:[%s2818_s20 + $0x768] sm:$0xff] }
 0x2d1   : > { %2243 = vst [vmem:[%s3163_s5 + $0x608] sm:$0xff] %v1789_v23  ;;  %2244 = vst [vmem:[%s3163_s5 + $0x610] sm:$0xff] %v1790_v17  ;;  %v1820_v23 = vmul.f32 %v2547_v14, %v3557_v18  ;;  %v1821_v17 = vmul.f32 %v2548_v16, %v3559_v20  ;;  %v2561_v2 = vld [vmem:[%s2818_s20 + $0x770] sm:$0xff]  ;;  %v2562_v55 = vld [vmem:[%s2818_s20 + $0x778] sm:$0xff] }
 0x2d2   : > { %2245 = vst [vmem:[%s3163_s5 + $0x618] sm:$0xff] %v1791_v1  ;;  %2246 = vst [vmem:[%s3163_s5 + $0x620] sm:$0xff] %v1792_v4  ;;  %v1822_v1 = vmul.f32 %v2549_v61, %v3557_v18  ;;  %v1823_v4 = vmul.f32 %v2550_v3, %v3559_v20  ;;  %v2563_v8 = vld [vmem:[%s2818_s20 + $0x780] sm:$0xff]  ;;  %v2564_v31 = vld [vmem:[%s2818_s20 + $0x788] sm:$0xff] }
 0x2d3   : > { %2247 = vst [vmem:[%s3163_s5 + $0x628] sm:$0xff] %v1793_v26  ;;  %2248 = vst [vmem:[%s3163_s5 + $0x630] sm:$0xff] %v1794_v28  ;;  %v1824_v26 = vmul.f32 %v2551_v25, %v3557_v18  ;;  %v1825_v28 = vmul.f32 %v2552_v27, %v3559_v20  ;;  %v2565_v43 = vld [vmem:[%s2818_s20 + $0x790] sm:$0xff]  ;;  %v2566_v57 = vld [vmem:[%s2818_s20 + $0x798] sm:$0xff] }
 0x2d4   : > { %2249 = vst [vmem:[%s3163_s5 + $0x638] sm:$0xff] %v1795_v33  ;;  %2250 = vst [vmem:[%s3163_s5 + $0x640] sm:$0xff] %v1796_v35  ;;  %v1826_v33 = vmul.f32 %v2553_v30, %v3557_v18  ;;  %v1827_v35 = vmul.f32 %v2554_v34, %v3559_v20  ;;  %v2567_v5 = vld [vmem:[%s2818_s20 + $0x7a0] sm:$0xff]  ;;  %v2568_v19 = vld [vmem:[%s2818_s20 + $0x7a8] sm:$0xff] }
 0x2d5   : > { %2251 = vst [vmem:[%s3163_s5 + $0x648] sm:$0xff] %v1797_v39  ;;  %2252 = vst [vmem:[%s3163_s5 + $0x650] sm:$0xff] %v1798_v42  ;;  %v1828_v39 = vmul.f32 %v2555_v37, %v3557_v18  ;;  %v1829_v42 = vmul.f32 %v2556_v41, %v3559_v20  ;;  %v2569_v32 = vld [vmem:[%s2818_s20 + $0x7b0] sm:$0xff]  ;;  %v2570_v48 = vld [vmem:[%s2818_s20 + $0x7b8] sm:$0xff] }
 0x2d6   : > { %2253 = vst [vmem:[%s3163_s5 + $0x658] sm:$0xff] %v1799_v45  ;;  %2254 = vst [vmem:[%s3163_s5 + $0x660] sm:$0xff] %v1800_v49  ;;  %v1830_v45 = vmul.f32 %v2557_v44, %v3557_v18  ;;  %v1831_v49 = vmul.f32 %v2558_v46, %v3559_v20  ;;  %v2571_v63 = vld [vmem:[%s2818_s20 + $0x7c0] sm:$0xff]  ;;  %v2572_v15 = vld [vmem:[%s2818_s20 + $0x7c8] sm:$0xff] }
 0x2d7   : > { %2255 = vst [vmem:[%s3163_s5 + $0x668] sm:$0xff] %v1801_v52  ;;  %2256 = vst [vmem:[%s3163_s5 + $0x670] sm:$0xff] %v1802_v0  ;;  %v1832_v52 = vmul.f32 %v2559_v51, %v3557_v18  ;;  %v1833_v0 = vmul.f32 %v2560_v59, %v3559_v20  ;;  %v2573_v29 = vld [vmem:[%s2818_s20 + $0x7d0] sm:$0xff]  ;;  %v2574_v47 = vld [vmem:[%s2818_s20 + $0x7d8] sm:$0xff] }
 0x2d8   : > { %2257 = vst [vmem:[%s3163_s5 + $0x678] sm:$0xff] %v1803_v53  ;;  %2258 = vst [vmem:[%s3163_s5 + $0x680] sm:$0xff] %v1804_v6  ;;  %v1834_v53 = vmul.f32 %v2561_v2, %v3557_v18  ;;  %v1835_v6 = vmul.f32 %v2562_v55, %v3559_v20  ;;  %v2575_v60 = vld [vmem:[%s2818_s20 + $0x7e0] sm:$0xff]  ;;  %v2576_v10 = vld [vmem:[%s2818_s20 + $0x7e8] sm:$0xff] }
 0x2d9   : > { %2259 = vst [vmem:[%s3163_s5 + $0x688] sm:$0xff] %v1805_v58  ;;  %2260 = vst [vmem:[%s3163_s5 + $0x690] sm:$0xff] %v1806_v36  ;;  %v1836_v58 = vmul.f32 %v2563_v8, %v3557_v18  ;;  %v1837_v36 = vmul.f32 %v2564_v31, %v3559_v20  ;;  %v2577_v13 = vld [vmem:[%s2818_s20 + $0x7f0] sm:$0xff]  ;;  %v2578_v14 = vld [vmem:[%s2818_s20 + $0x7f8] sm:$0xff] }
 0x2da   : > { %2261 = vst [vmem:[%s3163_s5 + $0x698] sm:$0xff] %v1807_v50  ;;  %2262 = vst [vmem:[%s3163_s5 + $0x6a0] sm:$0xff] %v1808_v62  ;;  %v1838_v50 = vmul.f32 %v2565_v43, %v3557_v18  ;;  %v1839_v62 = vmul.f32 %v2566_v57, %v3559_v20 }
 0x2db   : > { %2263 = vst [vmem:[%s3163_s5 + $0x6a8] sm:$0xff] %v1809_v12  ;;  %2264 = vst [vmem:[%s3163_s5 + $0x6b0] sm:$0xff] %v1810_v24  ;;  %v1840_v12 = vmul.f32 %v2567_v5, %v3557_v18  ;;  %v1841_v24 = vmul.f32 %v2568_v19, %v3559_v20 }
 0x2dc   : > { %2265 = vst [vmem:[%s3163_s5 + $0x6b8] sm:$0xff] %v1811_v40  ;;  %2266 = vst [vmem:[%s3163_s5 + $0x6c0] sm:$0xff] %v1812_v54  ;;  %v1842_v40 = vmul.f32 %v2569_v32, %v3557_v18  ;;  %v1843_v54 = vmul.f32 %v2570_v48, %v3559_v20 }
 0x2dd   : > { %2267 = vst [vmem:[%s3163_s5 + $0x6c8] sm:$0xff] %v1813_v7  ;;  %2268 = vst [vmem:[%s3163_s5 + $0x6d0] sm:$0xff] %v1814_v21  ;;  %v1844_v7 = vmul.f32 %v2571_v63, %v3557_v18  ;;  %v1845_v21 = vmul.f32 %v2572_v15, %v3559_v20 }
 0x2de   : > { %2269 = vst [vmem:[%s3163_s5 + $0x6d8] sm:$0xff] %v1815_v38  ;;  %2270 = vst [vmem:[%s3163_s5 + $0x6e0] sm:$0xff] %v1816_v56  ;;  %v1846_v38 = vmul.f32 %v2573_v29, %v3557_v18  ;;  %v1847_v56 = vmul.f32 %v2574_v47, %v3559_v20 }
 0x2df   : > { %2271 = vst [vmem:[%s3163_s5 + $0x6e8] sm:$0xff] %v1817_v9  ;;  %2272 = vst [vmem:[%s3163_s5 + $0x6f0] sm:$0xff] %v1818_v11  ;;  %v1848_v9 = vmul.f32 %v2575_v60, %v3557_v18  ;;  %v1849_v11 = vmul.f32 %v2576_v10, %v3559_v20 }
 0x2e0   : > { %2273 = vst [vmem:[%s3163_s5 + $0x6f8] sm:$0xff] %v1819_v22  ;;  %2274 = vst [vmem:[%s3163_s5 + $0x700] sm:$0xff] %v1820_v23  ;;  %v1850_v22 = vmul.f32 %v2577_v13, %v3557_v18  ;;  %v1851_v23 = vmul.f32 %v2578_v14, %v3559_v20 }
 0x2e1   : > { %2275 = vst [vmem:[%s3163_s5 + $0x708] sm:$0xff] %v1821_v17  ;;  %2276 = vst [vmem:[%s3163_s5 + $0x710] sm:$0xff] %v1822_v1 }
 0x2e2   : > { %2277 = vst [vmem:[%s3163_s5 + $0x718] sm:$0xff] %v1823_v4  ;;  %2278 = vst [vmem:[%s3163_s5 + $0x720] sm:$0xff] %v1824_v26 }
 0x2e3   : > { %2279 = vst [vmem:[%s3163_s5 + $0x728] sm:$0xff] %v1825_v28  ;;  %2280 = vst [vmem:[%s3163_s5 + $0x730] sm:$0xff] %v1826_v33 }
 0x2e4   : > { %2281 = vst [vmem:[%s3163_s5 + $0x738] sm:$0xff] %v1827_v35  ;;  %2282 = vst [vmem:[%s3163_s5 + $0x740] sm:$0xff] %v1828_v39 }
 0x2e5   : > { %2283 = vst [vmem:[%s3163_s5 + $0x748] sm:$0xff] %v1829_v42  ;;  %2284 = vst [vmem:[%s3163_s5 + $0x750] sm:$0xff] %v1830_v45 }
 0x2e6   : > { %2285 = vst [vmem:[%s3163_s5 + $0x758] sm:$0xff] %v1831_v49  ;;  %2286 = vst [vmem:[%s3163_s5 + $0x760] sm:$0xff] %v1832_v52 }
 0x2e7   : > { %2287 = vst [vmem:[%s3163_s5 + $0x768] sm:$0xff] %v1833_v0  ;;  %2288 = vst [vmem:[%s3163_s5 + $0x770] sm:$0xff] %v1834_v53 }
 0x2e8   : > { %2289 = vst [vmem:[%s3163_s5 + $0x778] sm:$0xff] %v1835_v6  ;;  %2290 = vst [vmem:[%s3163_s5 + $0x780] sm:$0xff] %v1836_v58 }
 0x2e9   : > { %2291 = vst [vmem:[%s3163_s5 + $0x788] sm:$0xff] %v1837_v36  ;;  %2292 = vst [vmem:[%s3163_s5 + $0x790] sm:$0xff] %v1838_v50 }
 0x2ea   : > { %2293 = vst [vmem:[%s3163_s5 + $0x798] sm:$0xff] %v1839_v62  ;;  %2294 = vst [vmem:[%s3163_s5 + $0x7a0] sm:$0xff] %v1840_v12 }
 0x2eb   : > { %2295 = vst [vmem:[%s3163_s5 + $0x7a8] sm:$0xff] %v1841_v24  ;;  %2296 = vst [vmem:[%s3163_s5 + $0x7b0] sm:$0xff] %v1842_v40 }
 0x2ec   : > { %2297 = vst [vmem:[%s3163_s5 + $0x7b8] sm:$0xff] %v1843_v54  ;;  %2298 = vst [vmem:[%s3163_s5 + $0x7c0] sm:$0xff] %v1844_v7 }
 0x2ed   : > { %2299 = vst [vmem:[%s3163_s5 + $0x7c8] sm:$0xff] %v1845_v21  ;;  %2300 = vst [vmem:[%s3163_s5 + $0x7d0] sm:$0xff] %v1846_v38 }
 0x2ee   : > { %2301 = vst [vmem:[%s3163_s5 + $0x7d8] sm:$0xff] %v1847_v56  ;;  %2302 = vst [vmem:[%s3163_s5 + $0x7e0] sm:$0xff] %v1848_v9 }
 0x2ef   : > { %2303 = vst [vmem:[%s3163_s5 + $0x7e8] sm:$0xff] %v1849_v11  ;;  %2304 = vst [vmem:[%s3163_s5 + $0x7f0] sm:$0xff] %v1850_v22 }
 0x2f0   : > { %2305 = vst [vmem:[%s3163_s5 + $0x7f8] sm:$0xff] %v1851_v23 }
 0x2f1 PF: > { %s13_s12 = sadd.s32 1, %s2585_s12  }
 0x2f2   : > { %p10_p4 = scmp.ge.s32.totalorder %s13_s12, 4  }
 0x2f4   :  { %12 = sbr.rel (!%p10_p4) target bundleno = 1 (0x1), region = 64 }

</bundles_post_ra>
